<compile_context>
chip_gen: v7x
topology: tpu7x:2x2x1
jax: 0.10.0
libtpu: 0.0.40
codegen_flags: <defaults>
</compile_context>

<pallas_src>
import functools
import math

import jax
import jax.numpy as jnp
from jax.experimental import pallas as pl
from jax.experimental.pallas import tpu as pltpu


_COMPUTE_DTYPE = jnp.bfloat16     # matmul operand / intermediate activation dtype
_LEAKY_SLOPE = 0.01               # torch.nn.LeakyReLU() default
_ROW_TILE_CAP = 128               # upper bound on output rows per grid step
_VMEM_BUDGET = 30 * 1024 * 1024   # lane-padded per-step estimate target
_VMEM_LIMIT = 48 * 1024 * 1024    # > 32 MiB scoped default, < 64 MiB v7x physical


def _round_up(v, m):
    return -(-v // m) * m


def _lane_pad(c):
    return _round_up(c, 128)


def _conv_vmem_bytes(th, w_out, wp, pad, cin, cout, out_bytes):
    """Pessimistic (lane-padded) per-grid-step VMEM estimate."""
    body = 2 * th * wp * _lane_pad(cin) * 2                 # double-buffered input
    halo = 2 * (2 * pad) * wp * _lane_pad(cin) * 2
    slab = (th + 2 * pad) * wp * _lane_pad(3 * cin) * 2     # folded-LHS scratch
    lhs = th * wp * _lane_pad(3 * cin) * 2                  # one ky window live
    acc = th * wp * _lane_pad(cout) * 4                     # f32 accumulator
    outb = 2 * th * _round_up(w_out, 8) * _lane_pad(cout) * out_bytes
    epi = th * _round_up(w_out, 8) * _lane_pad(cout) * 4    # epilogue temporary
    return body + halo + slab + lhs + acc + outb + epi


def _conv_row_tiling(H, w_out, pad, cin, cout, out_bytes, cap,
                     budget=_VMEM_BUDGET):
    """Pick (row_tile, padded_H, padded_W).  row_tile is a multiple of 2*pad
    (halo-block alignment); padded_W is a multiple of 16 so all bf16 reshapes/
    slices along the flattened row axis stay sublane-tile aligned.  The tile is
    chosen to minimise grid steps, then wasted rows, under the VMEM budget."""
    wp = _round_up(w_out + 2 * pad, 16)
    step = 2 * pad
    cands = [t for t in range(step, cap + 1, step)
             if _conv_vmem_bytes(t, w_out, wp, pad, cin, cout, out_bytes) <= budget]
    if not cands:
        cands = [step]
    th = min(cands, key=lambda t: (-(-H // t), _round_up(H, t), -t))
    return th, _round_up(H, th), wp


# ----------------------------------------------------------------------------
# Pallas kernel: 3x3 (dilated) conv + bias + LeakyReLU on a flat NHWC row-slab.
# One grid step = one (batch, row-tile).  The 3 kx taps are folded into the
# contraction (K = 3*Cin); only 3 matmuls (one per ky) hit the accumulator.
# ----------------------------------------------------------------------------
def _conv3x3_kernel(body_ref, halo_ref, w_ref, *refs, th, w_out, wp, pad, dil,
                    cin, cout, has_bias, apply_act, slope):
    if has_bias:
        b_ref, o_ref, slab_ref = refs
    else:
        b_ref = None
        o_ref, slab_ref = refs

    nb = th * wp            # flattened body rows
    nh = 2 * pad * wp       # flattened halo rows
    body = body_ref[0]      # (nb, cin) bf16
    halo = halo_ref[0]      # (nh, cin) bf16

    # Build the kx-folded LHS slab: lane-group kx holds the input shifted left
    # by kx*dil columns.  The flat shift never needs data from the next row for
    # the kept output columns (x + kx*dil <= W-1 + 2*pad < wp), so body and
    # halo can be shifted independently; the (tiny) tail rows of each group only
    # feed the discarded columns x >= W and are zero-filled for hygiene.
    for kx in range(3):
        s = kx * dil
        lo, hi = kx * cin, (kx + 1) * cin
        if s == 0:
            slab_ref[0:nb, lo:hi] = body
            slab_ref[nb:nb + nh, lo:hi] = halo
        else:
            slab_ref[0:nb - s, lo:hi] = body[s:, :]
            slab_ref[nb - s:nb, lo:hi] = jnp.zeros((s, cin), slab_ref.dtype)
            slab_ref[nb:nb + nh - s, lo:hi] = halo[s:, :]
            slab_ref[nb + nh - s:nb + nh, lo:hi] = jnp.zeros((s, cin),
                                                             slab_ref.dtype)

    # 3 matmuls with K = 3*Cin; the ky row-window offsets (ky*dil*wp) are
    # multiples of wp (itself a multiple of 16) -> aligned, layout-free slices.
    acc = jnp.zeros((nb, cout), jnp.float32)
    for ky in range(3):
        off = ky * dil * wp
        acc = acc + jnp.dot(slab_ref[off:off + nb, :], w_ref[ky],
                            preferred_element_type=jnp.float32)

    out = acc.reshape(th, wp, cout)[:, :w_out, :]   # drop right-pad garbage cols
    if has_bias:
        out = out + b_ref[...]                      # (1, Cout) f32 bias
    if apply_act:
        out = jnp.where(out >= 0, out, slope * out)  # LeakyReLU(0.01)
    o_ref[0] = out.astype(o_ref.dtype)


def conv3x3_nhwc(x, w, b, pad, dil, apply_act, out_dtype=None,
                 slope=_LEAKY_SLOPE, row_tile_cap=None):
    """x: (B, H, W, Cin) NHWC. w: torch layout (Cout, Cin, 3, 3). b: (Cout,)|None.
    3x3 conv, stride 1, padding == dilation (as in HumanNet), + optional LeakyReLU."""
    assert pad == dil, "HumanNet convs always use padding == dilation"
    B, H, W, Cin = x.shape
    Cout = w.shape[0]
    out_dtype = x.dtype if out_dtype is None else out_dtype
    out_bytes = jnp.dtype(out_dtype).itemsize
    cap = _ROW_TILE_CAP if row_tile_cap is None else row_tile_cap

    th, H_pad, wp = _conv_row_tiling(H, W, pad, Cin, Cout, out_bytes, cap)
    n_h = H_pad // th
    halo_step = th // (2 * pad)
    # The halo block of tile i reads padded rows [(i+1)*th, (i+1)*th + 2*pad);
    # the bottom spatial padding below guarantees those rows exist for i=n_h-1.
    assert th % (2 * pad) == 0 and H_pad % th == 0

    x = x.astype(_COMPUTE_DTYPE)
    xp = jnp.pad(x, ((0, 0), (pad, pad + (H_pad - H)),
                     (pad, wp - W - pad), (0, 0)))
    assert xp.shape[1] == H_pad + 2 * pad and xp.shape[2] == wp
    xf = xp.reshape(B, (H_pad + 2 * pad) * wp, Cin)   # flat row-major view

    # Weights -> (3, 3*Cin, Cout) bf16: w3[ky, kx*Cin + ci, co] = w[co, ci, ky, kx]
    w3 = jnp.transpose(w, (2, 3, 1, 0)).reshape(3, 3 * Cin, Cout)
    w3 = w3.astype(_COMPUTE_DTYPE)
    has_bias = b is not None

    kern = functools.partial(
        _conv3x3_kernel, th=th, w_out=W, wp=wp, pad=pad, dil=dil, cin=Cin,
        cout=Cout, has_bias=has_bias, apply_act=apply_act, slope=slope)

    in_specs = [
        # main row-slab: flattened padded rows [i*th, i*th + th)
        pl.BlockSpec((1, th * wp, Cin), lambda bi, i: (bi, i, 0)),
        # bottom halo: flattened padded rows [(i+1)*th, (i+1)*th + 2*pad)
        pl.BlockSpec((1, 2 * pad * wp, Cin),
                     lambda bi, i: (bi, (i + 1) * halo_step, 0)),
        pl.BlockSpec((3, 3 * Cin, Cout), lambda bi, i: (0, 0, 0)),   # weights
    ]
    operands = [xf, xf, w3]
    if has_bias:
        in_specs.append(pl.BlockSpec((1, Cout), lambda bi, i: (0, 0)))
        operands.append(b.reshape(1, Cout).astype(jnp.float32))

    out = pl.pallas_call(
        kern,
        out_shape=jax.ShapeDtypeStruct((B, H_pad, W, Cout), out_dtype),
        grid_spec=pltpu.PrefetchScalarGridSpec(
            num_scalar_prefetch=0,
            grid=(B, n_h),
            in_specs=in_specs,
            out_specs=pl.BlockSpec((1, th, W, Cout), lambda bi, i: (bi, i, 0, 0)),
            scratch_shapes=[
                pltpu.VMEM(((th + 2 * pad) * wp, 3 * Cin), _COMPUTE_DTYPE)],
        ),
        compiler_params=pltpu.CompilerParams(
            dimension_semantics=("parallel", "parallel"),
            vmem_limit_bytes=_VMEM_LIMIT,
        ),
    )(*operands)

    if H_pad != H:
        out = out[:, :H]
    return out


# ----------------------------------------------------------------------------
# MaxPool2d(2,2) and bilinear 2x upsample (align_corners=False) — NHWC, XLA glue
# TODO(synk): fuse these into the adjacent conv kernels (review item 5).
# ----------------------------------------------------------------------------
def maxpool2x2_nhwc(x):
    B, H, W, C = x.shape
    return x.reshape(B, H // 2, 2, W // 2, 2, C).max(axis=(2, 4))


def _upsample2x_axis(a, axis):
    n = a.shape[axis]
    pad_cfg = [(0, 0)] * a.ndim
    pad_cfg[axis] = (1, 1)
    ap = jnp.pad(a, pad_cfg, mode="edge")
    prev = jax.lax.slice_in_dim(ap, 0, n, axis=axis)
    mid = jax.lax.slice_in_dim(ap, 1, n + 1, axis=axis)
    nxt = jax.lax.slice_in_dim(ap, 2, n + 2, axis=axis)
    even = 0.25 * prev + 0.75 * mid
    odd = 0.75 * mid + 0.25 * nxt
    out = jnp.stack([even, odd], axis=axis + 1)
    new_shape = list(a.shape)
    new_shape[axis] = 2 * n
    return out.reshape(new_shape)


def upsample2x_bilinear_nhwc(x):
    # nn.Upsample(scale_factor=2, mode='bilinear'), align_corners=False
    x = _upsample2x_axis(x, 1)
    x = _upsample2x_axis(x, 2)
    return x


# ----------------------------------------------------------------------------
# QuantizationLayer (ValueLayer.forward == trilinear_kernel exactly)
# ----------------------------------------------------------------------------
def trilinear_kernel_vals(ts, num_channels):
    c = num_channels
    gt = jnp.where(ts >= 0, 1.0 - (c - 1) * ts, (c - 1) * ts + 1.0)
    gt = jnp.where(ts < -1.0 / (c - 1), 0.0, gt)
    gt = jnp.where(ts >= 1.0 / (c - 1), 0.0, gt)
    return gt


def quantization_layer(events, batchsize, dim):
    # TODO(synk): Tensor.put_(accumulate=True) is a data-dependent scatter-add
    # with no clean Pallas TPU equivalent at this scale; implemented as ONE
    # fused jnp scatter (jnp silently drops out-of-range indices).
    C, H, W = dim
    x, y, t, p, b = [events[:, i] for i in range(5)]
    p = (p + 1.0) / 2.0
    xi = x.astype(jnp.int32)
    yi = y.astype(jnp.int32)
    pi = p.astype(jnp.int32)
    bi = b.astype(jnp.int32)
    idx_before = xi + W * yi + W * H * C * pi + W * H * C * 2 * bi      # (N,)

    bins = jnp.arange(C, dtype=jnp.float32)                              # (C,)
    vals = t[None, :] * trilinear_kernel_vals(
        t[None, :] - bins[:, None] / (C - 1), C)                         # (C, N)
    idx = idx_before[None, :] + (W * H) * jnp.arange(C, dtype=jnp.int32)[:, None]

    vox = jnp.zeros((2 * C * H * W * batchsize,), jnp.float32)
    vox = vox.at[idx.reshape(-1)].add(vals.reshape(-1))                  # one scatter

    vox = vox.reshape(batchsize, 2, C, H, W)
    vox = jnp.concatenate([vox[:, 0], vox[:, 1]], axis=1)                # (B, 2C, H, W)

    def _norm_one(v):
        mask = jnp.abs(v) > 0
        cnt = jnp.sum(mask.astype(jnp.float32))
        mean = jnp.where(cnt > 0,
                         jnp.sum(jnp.where(mask, v, 0.0)) / jnp.maximum(cnt, 1.0), 0.0)
        var = jnp.where(cnt > 1,
                        jnp.sum(jnp.where(mask, (v - mean) ** 2, 0.0))
                        / jnp.maximum(cnt - 1.0, 1.0), 0.0)
        std = jnp.sqrt(var)
        return jnp.where(mask, (v - mean) / (std + 1e-3), v)

    return jax.vmap(_norm_one)(vox)


# ----------------------------------------------------------------------------
# HumanNet forward (all convs go through the Pallas conv kernel, NHWC resident)
# ----------------------------------------------------------------------------
def human_net_forward(x_nchw, P):
    # Single NCHW -> NHWC transpose at the input; NHWC (channels on lanes) until
    # the very end.
    x = jnp.transpose(x_nchw, (0, 2, 3, 1)).astype(_COMPUTE_DTYPE)
    B, H, W, _ = x.shape
    ph = (4 - H % 4) % 4
    pw = (4 - W % 4) % 4
    top, bot = ph // 2, ph - ph // 2
    left, right = pw // 2, pw - pw // 2
    x = jnp.pad(x, ((0, 0), (top, bot), (left, right), (0, 0)))

    c = conv3x3_nhwc
    x = maxpool2x2_nhwc(c(x, P["w01"], P["b01"], 1, 1, True))
    x = c(x, P["w02"], None, 1, 1, True)
    x = c(x, P["w03"], None, 1, 1, True)
    x = maxpool2x2_nhwc(c(x, P["w04"], None, 1, 1, True))
    x = c(x, P["w05"], None, 2, 2, True)
    x = c(x, P["w06"], None, 2, 2, True)
    x = c(x, P["w07"], None, 2, 2, True)
    x = c(x, P["w08"], None, 2, 2, True)
    x = c(upsample2x_bilinear_nhwc(x), P["w09"], None, 1, 1, True)
    x = c(x, P["w10"], None, 2, 2, True)
    x = c(x, P["w11"], None, 2, 2, True)
    x = c(x, P["w12"], None, 2, 2, True)
    x = c(x, P["w13"], None, 2, 2, True)
    x = c(upsample2x_bilinear_nhwc(x), P["w14"], None, 1, 1, True)
    x = c(x, P["w15"], None, 1, 1, True)
    x = c(x, P["w16"], None, 1, 1, True)
    x = c(x, P["w17"], None, 1, 1, False, out_dtype=jnp.float32)

    # unpadder: ConstantPad2d with negative pads, exact same arithmetic as torch
    cl, cr = -((-pw) // 2), pw - pw // 2
    ct, cb = -((-ph) // 2), ph - ph // 2
    Hq, Wq = x.shape[1], x.shape[2]
    x = x[:, ct:Hq - cb, cl:Wq - cr, :]
    return jnp.transpose(x, (0, 3, 1, 2))   # NHWC -> NCHW for the module API


def human_pose_net_forward(events, batchsize, params, voxel_dim, train=False):
    vox = quantization_layer(events, batchsize, voxel_dim)
    # TODO(synk): AugmentationModule (tgm.HomographyWarper, train-only) not
    # implemented; eval path (train=False) returns hom=None as in the module.
    hom = None
    pred = human_net_forward(vox, params)
    return pred, vox, hom


# ----------------------------------------------------------------------------
# Deterministic parameter init (PyTorch Conv2d-style uniform(-1/sqrt(fan_in), .))
# ----------------------------------------------------------------------------
def init_params(key, nc):
    cfg = [
        ("01", 16, nc, True),
        ("02", 32, 16, False), ("03", 32, 32, False), ("04", 32, 32, False),
        ("05", 64, 32, False), ("06", 64, 64, False), ("07", 64, 64, False),
        ("08", 64, 64, False),
        ("09", 32, 64, False), ("10", 32, 32, False), ("11", 32, 32, False),
        ("12", 32, 32, False), ("13", 32, 32, False),
        ("14", 16, 32, False), ("15", 16, 16, False), ("16", 16, 16, False),
        ("17", 13, 16, False),
    ]
    params = {}
    for i, (tag, cout, cin, has_bias) in enumerate(cfg):
        kw, kb = jax.random.split(jax.random.fold_in(key, i))
        bound = 1.0 / math.sqrt(cin * 9)
        params["w" + tag] = jax.random.uniform(
            kw, (cout, cin, 3, 3), jnp.float32, -bound, bound)
        if has_bias:
            params["b" + tag] = jax.random.uniform(
                kb, (cout,), jnp.float32, -bound, bound)
    return params


# ----------------------------------------------------------------------------
# Self-check helpers: Pallas conv vs XLA reference at small shapes
# ----------------------------------------------------------------------------
def _conv_reference(x, w, b, pad, dil, apply_act, slope=_LEAKY_SLOPE):
    out = jax.lax.conv_general_dilated(
        x.astype(jnp.float32),
        jnp.transpose(w, (2, 3, 1, 0)).astype(jnp.float32),   # HWIO
        window_strides=(1, 1),
        padding=[(pad, pad), (pad, pad)],
        rhs_dilation=(dil, dil),
        dimension_numbers=("NHWC", "HWIO", "NHWC"),
        precision=jax.lax.Precision.HIGHEST)
    if b is not None:
        out = out + b.astype(jnp.float32)
    if apply_act:
        out = jnp.where(out >= 0, out, slope * out)
    return out


def _check_conv(key, B, H, W, cin, cout, pad, dil, has_bias, cap=None):
    kx_, kw_, kb_ = jax.random.split(key, 3)
    x = jax.random.uniform(kx_, (B, H, W, cin), jnp.float32, -1.0, 1.0)
    bound = 1.0 / math.sqrt(cin * 9)
    w = jax.random.uniform(kw_, (cout, cin, 3, 3), jnp.float32, -bound, bound)
    b = (jax.random.uniform(kb_, (cout,), jnp.float32, -bound, bound)
         if has_bias else None)
    got = conv3x3_nhwc(x, w, b, pad, dil, True, out_dtype=jnp.float32,
                       row_tile_cap=cap)
    want = _conv_reference(x, w, b, pad, dil, True)
    err = float(jnp.max(jnp.abs(got - want)))
    assert err < 5e-2, f"conv mismatch (B={B},H={H},W={W},cin={cin},dil={dil}): {err}"


if __name__ == "__main__":
    key = jax.random.PRNGKey(0)

    # Unit checks of the Pallas conv kernel (incl. multi-tile + dilated cases).
    ck = jax.random.fold_in(key, 123)
    _check_conv(jax.random.fold_in(ck, 0), 2, 16, 16, 8, 16, 1, 1, True)
    _check_conv(jax.random.fold_in(ck, 1), 2, 8, 8, 32, 64, 2, 2, False)
    _check_conv(jax.random.fold_in(ck, 2), 1, 40, 16, 16, 16, 1, 1, False, cap=16)
    _check_conv(jax.random.fold_in(ck, 3), 1, 24, 8, 32, 32, 2, 2, False, cap=8)

    # Full HumanPoseNet forward at small shapes.
    VOXEL_DIM = (4, 16, 16)      # (C, H, W) — small stand-in for (15, 346, 346)
    BATCH = 2
    NUM_JOINTS = 13
    NC = 2 * VOXEL_DIM[0]

    pkey, ekey = jax.random.split(key)
    params = init_params(pkey, NC)

    # Synthetic events: rows are (x, y, t, p, b)
    N_EVENTS = 64
    C, H, W = VOXEL_DIM
    ks = jax.random.split(ekey, 5)
    ex = jax.random.randint(ks[0], (N_EVENTS,), 0, W).astype(jnp.float32)
    ey = jax.random.randint(ks[1], (N_EVENTS,), 0, H).astype(jnp.float32)
    et = jax.random.uniform(ks[2], (N_EVENTS,), jnp.float32, 0.0, 1.0)
    ep = jax.random.randint(ks[3], (N_EVENTS,), 0, 2).astype(jnp.float32) * 2.0 - 1.0
    eb = jax.random.randint(ks[4], (N_EVENTS,), 0, BATCH).astype(jnp.float32)
    events = jnp.stack([ex, ey, et, ep, eb], axis=1)   # (64, 5)

    fwd = jax.jit(lambda ev: human_pose_net_forward(ev, BATCH, params, VOXEL_DIM))
    pred, vox, hom = fwd(events)
    jax.block_until_ready((pred, vox))

    assert pred.shape == (BATCH, NUM_JOINTS, H, W), pred.shape
    assert vox.shape == (BATCH, 2 * C, H, W), vox.shape
    assert hom is None
    assert bool(jnp.all(jnp.isfinite(pred))), "non-finite values in prediction"
    print("KERNEL_OK")
</pallas_src>

<mosaic_0001>
module attributes {stable_mosaic.version = 11 : i64} {
  func.func @_conv3x3_kernel(%arg0: i32, %arg1: i32, %arg2: memref<1x512x8xbf16, #tpu.memory_space<vmem>>, %arg3: memref<1x64x8xbf16, #tpu.memory_space<vmem>>, %arg4: memref<3x24x16xbf16, #tpu.memory_space<vmem>>, %arg5: memref<1x16xf32, #tpu.memory_space<vmem>>, %arg6: memref<1x16x16x16xf32, #tpu.memory_space<vmem>>, %arg7: memref<576x24xbf16, #tpu.memory_space<vmem>>) attributes {dimension_semantics = [#tpu.dimension_semantics<parallel>, #tpu.dimension_semantics<parallel>], iteration_bounds = array<i64: 2, 1>, scalar_prefetch = 0 : i64, scratch_operands = 1 : i64, tpu.core_type = #tpu.core_type<tc>, window_params = [{transform_indices = @transform_0, window_bounds = array<i64: 1, 512, 8>}, {transform_indices = @transform_1, window_bounds = array<i64: 1, 64, 8>}, {pipeline_mode = #tpu.pipeline_mode<synchronous>, transform_indices = @transform_2, window_bounds = array<i64: 3, 24, 16>}, {pipeline_mode = #tpu.pipeline_mode<synchronous>, transform_indices = @transform_3, window_bounds = array<i64: 1, 16>}, {transform_indices = @transform_4, window_bounds = array<i64: 1, 16, 16, 16>}]} {
    %c0 = arith.constant 0 : index
    %c0_0 = arith.constant 0 : index
    %c0_1 = arith.constant 0 : index
    %0 = vector.load %arg2[%c0, %c0_0, %c0_1] : memref<1x512x8xbf16, #tpu.memory_space<vmem>>, vector<1x512x8xbf16>
    %1 = vector.shape_cast %0 : vector<1x512x8xbf16> to vector<512x8xbf16>
    %c0_2 = arith.constant 0 : index
    %c0_3 = arith.constant 0 : index
    %c0_4 = arith.constant 0 : index
    %2 = vector.load %arg3[%c0_2, %c0_3, %c0_4] : memref<1x64x8xbf16, #tpu.memory_space<vmem>>, vector<1x64x8xbf16>
    %3 = vector.shape_cast %2 : vector<1x64x8xbf16> to vector<64x8xbf16>
    %c0_5 = arith.constant 0 : index
    %c0_6 = arith.constant 0 : index
    %4 = vector.load %arg7[%c0_5, %c0_6] : memref<576x24xbf16, #tpu.memory_space<vmem>>, vector<512x8xbf16>
    tpu.vector_store %arg7[%c0_5, %c0_6], %1 {strides = array<i32>} : memref<576x24xbf16, #tpu.memory_space<vmem>>, vector<512x8xbf16>,
    %c512 = arith.constant 512 : index
    %c0_7 = arith.constant 0 : index
    %5 = vector.load %arg7[%c512, %c0_7] : memref<576x24xbf16, #tpu.memory_space<vmem>>, vector<64x8xbf16>
    tpu.vector_store %arg7[%c512, %c0_7], %3 {strides = array<i32>} : memref<576x24xbf16, #tpu.memory_space<vmem>>, vector<64x8xbf16>,
    %6 = vector.extract_strided_slice %1 {offsets = [1, 0], sizes = [511, 8], strides = [1, 1]} : vector<512x8xbf16> to vector<511x8xbf16>
    %c0_8 = arith.constant 0 : index
    %c8 = arith.constant 8 : index
    %7 = vector.load %arg7[%c0_8, %c8] : memref<576x24xbf16, #tpu.memory_space<vmem>>, vector<511x8xbf16>
    tpu.vector_store %arg7[%c0_8, %c8], %6 {strides = array<i32>} : memref<576x24xbf16, #tpu.memory_space<vmem>>, vector<511x8xbf16>,
    %cst = arith.constant 0.000000e+00 : bf16
    %8 = vector.broadcast %cst : bf16 to vector<1x8xbf16>
    %c511 = arith.constant 511 : index
    %c8_9 = arith.constant 8 : index
    %9 = vector.load %arg7[%c511, %c8_9] : memref<576x24xbf16, #tpu.memory_space<vmem>>, vector<1x8xbf16>
    tpu.vector_store %arg7[%c511, %c8_9], %8 {strides = array<i32>} : memref<576x24xbf16, #tpu.memory_space<vmem>>, vector<1x8xbf16>,
    %10 = vector.extract_strided_slice %3 {offsets = [1, 0], sizes = [63, 8], strides = [1, 1]} : vector<64x8xbf16> to vector<63x8xbf16>
    %c512_10 = arith.constant 512 : index
    %c8_11 = arith.constant 8 : index
    %11 = vector.load %arg7[%c512_10, %c8_11] : memref<576x24xbf16, #tpu.memory_space<vmem>>, vector<63x8xbf16>
    tpu.vector_store %arg7[%c512_10, %c8_11], %10 {strides = array<i32>} : memref<576x24xbf16, #tpu.memory_space<vmem>>, vector<63x8xbf16>,
    %cst_12 = arith.constant 0.000000e+00 : bf16
    %12 = vector.broadcast %cst_12 : bf16 to vector<1x8xbf16>
    %c575 = arith.constant 575 : index
    %c8_13 = arith.constant 8 : index
    %13 = vector.load %arg7[%c575, %c8_13] : memref<576x24xbf16, #tpu.memory_space<vmem>>, vector<1x8xbf16>
    tpu.vector_store %arg7[%c575, %c8_13], %12 {strides = array<i32>} : memref<576x24xbf16, #tpu.memory_space<vmem>>, vector<1x8xbf16>,
    %14 = vector.extract_strided_slice %1 {offsets = [2, 0], sizes = [510, 8], strides = [1, 1]} : vector<512x8xbf16> to vector<510x8xbf16>
    %c0_14 = arith.constant 0 : index
    %c16 = arith.constant 16 : index
    %15 = vector.load %arg7[%c0_14, %c16] : memref<576x24xbf16, #tpu.memory_space<vmem>>, vector<510x8xbf16>
    tpu.vector_store %arg7[%c0_14, %c16], %14 {strides = array<i32>} : memref<576x24xbf16, #tpu.memory_space<vmem>>, vector<510x8xbf16>,
    %cst_15 = arith.constant 0.000000e+00 : bf16
    %16 = vector.broadcast %cst_15 : bf16 to vector<2x8xbf16>
    %c510 = arith.constant 510 : index
    %c16_16 = arith.constant 16 : index
    %17 = vector.load %arg7[%c510, %c16_16] : memref<576x24xbf16, #tpu.memory_space<vmem>>, vector<2x8xbf16>
    tpu.vector_store %arg7[%c510, %c16_16], %16 {strides = array<i32>} : memref<576x24xbf16, #tpu.memory_space<vmem>>, vector<2x8xbf16>,
    %18 = vector.extract_strided_slice %3 {offsets = [2, 0], sizes = [62, 8], strides = [1, 1]} : vector<64x8xbf16> to vector<62x8xbf16>
    %c512_17 = arith.constant 512 : index
    %c16_18 = arith.constant 16 : index
    %19 = vector.load %arg7[%c512_17, %c16_18] : memref<576x24xbf16, #tpu.memory_space<vmem>>, vector<62x8xbf16>
    tpu.vector_store %arg7[%c512_17, %c16_18], %18 {strides = array<i32>} : memref<576x24xbf16, #tpu.memory_space<vmem>>, vector<62x8xbf16>,
    %cst_19 = arith.constant 0.000000e+00 : bf16
    %20 = vector.broadcast %cst_19 : bf16 to vector<2x8xbf16>
    %c574 = arith.constant 574 : index
    %c16_20 = arith.constant 16 : index
    %21 = vector.load %arg7[%c574, %c16_20] : memref<576x24xbf16, #tpu.memory_space<vmem>>, vector<2x8xbf16>
    tpu.vector_store %arg7[%c574, %c16_20], %20 {strides = array<i32>} : memref<576x24xbf16, #tpu.memory_space<vmem>>, vector<2x8xbf16>,
    %cst_21 = arith.constant 0.000000e+00 : f32
    %22 = vector.broadcast %cst_21 : f32 to vector<512x16xf32>
    %c0_22 = arith.constant 0 : index
    %c0_23 = arith.constant 0 : index
    %23 = vector.load %arg7[%c0_22, %c0_23] : memref<576x24xbf16, #tpu.memory_space<vmem>>, vector<512x24xbf16>
    %c0_24 = arith.constant 0 : index
    %c0_25 = arith.constant 0 : index
    %c0_26 = arith.constant 0 : index
    %24 = vector.load %arg4[%c0_24, %c0_25, %c0_26] : memref<3x24x16xbf16, #tpu.memory_space<vmem>>, vector<1x24x16xbf16>
    %25 = vector.shape_cast %24 : vector<1x24x16xbf16> to vector<24x16xbf16>
    %cst_27 = arith.constant dense<0.000000e+00> : vector<512x16xf32>
    %26 = tpu.matmul %23, %25, %cst_27 {dimension_numbers = #tpu.dot_dimension_numbers<[1], [0], [0], [1], [0, 0, 1, 1], [], []>} : vector<512x24xbf16>, vector<24x16xbf16>, vector<512x16xf32> -> vector<512x16xf32>
    %27 = arith.addf %22, %26 : vector<512x16xf32>
    %c32 = arith.constant 32 : index
    %c0_28 = arith.constant 0 : index
    %28 = vector.load %arg7[%c32, %c0_28] : memref<576x24xbf16, #tpu.memory_space<vmem>>, vector<512x24xbf16>
    %c1 = arith.constant 1 : index
    %c0_29 = arith.constant 0 : index
    %c0_30 = arith.constant 0 : index
    %29 = vector.load %arg4[%c1, %c0_29, %c0_30] : memref<3x24x16xbf16, #tpu.memory_space<vmem>>, vector<1x24x16xbf16>
    %30 = vector.shape_cast %29 : vector<1x24x16xbf16> to vector<24x16xbf16>
    %cst_31 = arith.constant dense<0.000000e+00> : vector<512x16xf32>
    %31 = tpu.matmul %28, %30, %cst_31 {dimension_numbers = #tpu.dot_dimension_numbers<[1], [0], [0], [1], [0, 0, 1, 1], [], []>} : vector<512x24xbf16>, vector<24x16xbf16>, vector<512x16xf32> -> vector<512x16xf32>
    %32 = arith.addf %27, %31 : vector<512x16xf32>
    %c64 = arith.constant 64 : index
    %c0_32 = arith.constant 0 : index
    %33 = vector.load %arg7[%c64, %c0_32] : memref<576x24xbf16, #tpu.memory_space<vmem>>, vector<512x24xbf16>
    %c2 = arith.constant 2 : index
    %c0_33 = arith.constant 0 : index
    %c0_34 = arith.constant 0 : index
    %34 = vector.load %arg4[%c2, %c0_33, %c0_34] : memref<3x24x16xbf16, #tpu.memory_space<vmem>>, vector<1x24x16xbf16>
    %35 = vector.shape_cast %34 : vector<1x24x16xbf16> to vector<24x16xbf16>
    %cst_35 = arith.constant dense<0.000000e+00> : vector<512x16xf32>
    %36 = tpu.matmul %33, %35, %cst_35 {dimension_numbers = #tpu.dot_dimension_numbers<[1], [0], [0], [1], [0, 0, 1, 1], [], []>} : vector<512x24xbf16>, vector<24x16xbf16>, vector<512x16xf32> -> vector<512x16xf32>
    %37 = arith.addf %32, %36 : vector<512x16xf32>
    %38 = vector.shape_cast %37 : vector<512x16xf32> to vector<16x32x16xf32>
    %39 = vector.extract_strided_slice %38 {offsets = [0, 0, 0], sizes = [16, 16, 16], strides = [1, 1, 1]} : vector<16x32x16xf32> to vector<16x16x16xf32>
    %c0_36 = arith.constant 0 : index
    %c0_37 = arith.constant 0 : index
    %40 = vector.load %arg5[%c0_36, %c0_37] : memref<1x16xf32, #tpu.memory_space<vmem>>, vector<1x16xf32>
    %41 = vector.shape_cast %40 : vector<1x16xf32> to vector<1x1x16xf32>
    %42 = vector.broadcast %41 : vector<1x1x16xf32> to vector<16x16x16xf32>
    %43 = arith.addf %39, %42 : vector<16x16x16xf32>
    %cst_38 = arith.constant 0.000000e+00 : f32
    %44 = vector.broadcast %cst_38 : f32 to vector<16x16x16xf32>
    %45 = arith.cmpf oge, %43, %44 : vector<16x16x16xf32>
    %cst_39 = arith.constant 0.00999999977 : f32
    %46 = vector.broadcast %cst_39 : f32 to vector<16x16x16xf32>
    %47 = arith.mulf %46, %43 : vector<16x16x16xf32>
    %48 = arith.select %45, %43, %47 : vector<16x16x16xi1>, vector<16x16x16xf32>
    %c0_40 = arith.constant 0 : index
    %c0_41 = arith.constant 0 : index
    %c0_42 = arith.constant 0 : index
    %c0_43 = arith.constant 0 : index
    %49 = vector.load %arg6[%c0_40, %c0_41, %c0_42, %c0_43] : memref<1x16x16x16xf32, #tpu.memory_space<vmem>>, vector<1x16x16x16xf32>
    %50 = vector.shape_cast %49 : vector<1x16x16x16xf32> to vector<16x16x16xf32>
    %51 = vector.shape_cast %48 : vector<16x16x16xf32> to vector<1x16x16x16xf32>
    tpu.vector_store %arg6[%c0_40, %c0_41, %c0_42, %c0_43], %51 {strides = array<i32>} : memref<1x16x16x16xf32, #tpu.memory_space<vmem>>, vector<1x16x16x16xf32>,
    return
  }
  func.func @transform_0(%arg0: i32, %arg1: i32) -> (i32, i32, i32) {
    %c0_i32 = arith.constant 0 : i32
    %c0_i32_0 = arith.constant 0 : i32
    return %arg0, %arg1, %c0_i32 : i32, i32, i32
  }
  func.func @transform_1(%arg0: i32, %arg1: i32) -> (i32, i32, i32) {
    %c1_i32 = arith.constant 1 : i32
    %0 = arith.addi %arg1, %c1_i32 : i32
    %c8_i32 = arith.constant 8 : i32
    %1 = arith.muli %0, %c8_i32 : i32
    %c0_i32 = arith.constant 0 : i32
    %c0_i32_0 = arith.constant 0 : i32
    return %arg0, %1, %c0_i32 : i32, i32, i32
  }
  func.func @transform_2(%arg0: i32, %arg1: i32) -> (i32, i32, i32) {
    %c0_i32 = arith.constant 0 : i32
    %c0_i32_0 = arith.constant 0 : i32
    %c0_i32_1 = arith.constant 0 : i32
    %c0_i32_2 = arith.constant 0 : i32
    return %c0_i32, %c0_i32_0, %c0_i32_1 : i32, i32, i32
  }
  func.func @transform_3(%arg0: i32, %arg1: i32) -> (i32, i32) {
    %c0_i32 = arith.constant 0 : i32
    %c0_i32_0 = arith.constant 0 : i32
    %c0_i32_1 = arith.constant 0 : i32
    return %c0_i32, %c0_i32_0 : i32, i32
  }
  func.func @transform_4(%arg0: i32, %arg1: i32) -> (i32, i32, i32, i32) {
    %c0_i32 = arith.constant 0 : i32
    %c0_i32_0 = arith.constant 0 : i32
    %c0_i32_1 = arith.constant 0 : i32
    return %arg0, %arg1, %c0_i32, %c0_i32_0 : i32, i32, i32, i32
  }
}

</mosaic_0001>

<bundles_post_ra>
// kernel: tpu_custom_call.1
= control target key start
LH: loop header
LB: loop body
LE: loop exit
PB: predicated region body
PF: predicated region fallthrough
CT: control target
= control target key end

     0   :  { %9 = vsyncpa [#allocation4], 0  ;;  %s4610_s0 = inlined_call_operand.vmem [shape: bf16[2,576,8], index: 0, kind: input, shape index: {}]   ;;  %s4611_s1 = inlined_call_operand.vmem [shape: bf16[2,576,8], index: 1, kind: input, shape index: {}]   ;;  %s4612_s2 = inlined_call_operand.vmem [shape: bf16[3,24,16], index: 2, kind: input, shape index: {}]   ;;  %s4613_s3 = inlined_call_operand.vmem [shape: f32[1,16], index: 3, kind: input, shape index: {}]   ;;  %s4614_s4 = inlined_call_operand.hbm [shape: f32[2,16,16,16], index: 4, kind: output, shape index: {}]  }
   0x1   :  { %11 = vsyncpa [#allocation4 + $0x1], 0  ;;  %s3377_s15 = smov 0   ;;  %s3379_s16 = smov 0  }
   0x2   :  { %s3381_s17 = smov 0   ;;  %s3383_s18 = smov 0  }
   0x3   :  { %s3385_s19 = smov 0   ;;  %s3387_s20 = smov 0  }
   0x4 LB: > { %s2688_s21 = sadd.s32 4294967295, %s3345_s20   ;;  %s2689_s22 = sadd.s32 4294967294, %s3345_s20   ;;  %s3345_s20 = sphi %s3387_s20, %s17_s20   ;;  %s3341_s19 = sphi %s3385_s19, %s4625_s19   ;;  %s3337_s18 = sphi %s3383_s18, %s4624_s18   ;;  %s3333_s17 = sphi %s3381_s17, %s4623_s17   ;;  %s3329_s16 = sphi %s3379_s16, %s4622_s16   ;;  %s3325_s15 = sphi %s3377_s15, %s4621_s15  }
   0x5   : > { %s29_s23 = sadd.s32 1, %s3341_s19  ;;  %s140_s24 = sadd.s32 1, %s3333_s17 }
   0x6   : > { %p31_p0 = scmp.ge.s32.totalorder %s29_s23, 2  ;;  %p150_p1 = scmp.ne.s32.totalorder %s3333_s17, %s3329_s16 }
   0x7   : > { %p151_p2 = scmp.eq.s32.totalorder %s2688_s21, 1  ;;  %p156_p3 = scmp.ne.s32.totalorder %s3329_s16, %s3325_s15 }
   0x8   : > { %s4627_s23 = smov (%p31_p0, %s29_s23), 0  ;;  %p157_p5 = scmp.eq.s32.totalorder %s2689_s22, 1 }
   0x9   : > { %p3417_p4 = por %p151_p2, %p150_p1  ;;  %s135_s26 = ssub.s32 %s3341_s19, %s4627_s23 }
   0xa   : > { %p2692_p6 = scmp.ge.s32.totalorder %s3345_s20, 1  ;;  %p138_p7 = scmp.eq.s32.totalorder %s135_s26, 0 }
   0xb   : > { %p3424_p8 = por %p157_p5, %p156_p3  ;;  %p219_p9 = scmp.lt.s32.totalorder %s3345_s20, 3 }
   0xc   : > { %s3430_s28 = scalar_select %p138_p7, %s3333_s17, %s140_s24  }
   0xd   : > { %p220_p10 = pnand %p2692_p6, %p219_p9 }
   0xe   : > { %p269_p11 = scmp.lt.s32.totalorder (!%p220_p10), %s3337_s18, 1  ;;  %vm1070_vm0 = vcmask (!%p220_p10), 1046528   ;;  %vm623_vm1 = vsmask.f32 (!%p220_p10), 7424  ;;  %vm562_vm2 = vcmask (!%p220_p10), 64512   ;;  %s3347_s8 = smov (!%p220_p10), 16  }
   0xf   : > { %223 = sbr.rel (%p220_p10) target bundleno = 646 (0x286), region = 36  ;;  %s3348_s9 = smov (!%p220_p10), 8   ;;  %vm1437_vm3 = vcmask (!%p220_p10), 1043456   ;;  %vm975_vm4 = vcmask (!%p220_p10), 130112   ;;  %vm1230_vm5 = vcmask (!%p220_p10), 195712   ;;  %vm1340_vm6 = vcmask (!%p220_p10), 195584  }
  0x10   : > { %vm4126_vm7 = vmand (!%p220_p10), %vm975_vm4, %vm623_vm1  ;;  %vm1012_vm8 = vcmask (!%p220_p10), 130119   ;;  %vm1013_vm9 = vsmask.f32 (!%p220_p10), 7966  ;;  %vm1264_vm11 = vcmask (!%p220_p10), 195719   ;;  %vm1262_vm12 = vcmask (!%p220_p10), 194688   ;;  %s2848_s22 = sshll.u32 (!%p220_p10), %s3337_s18, 12 }
  0x11   : > { %vm4147_vm10 = vmand (!%p220_p10), %vm1012_vm8, %vm1013_vm9  ;;  %vm2541_vm14 = vcmask (!%p220_p10), 130048   ;;  %s3350_s6 = smov (!%p220_p10), [#allocation3]  }
  0x16   : > { %s3434_s29 = scalar_select %p269_p11, %s3337_s18, 1 }
  0x18   : > { %s3163_s30 = smul.u32 288, %s3434_s29 }
  0x1a   : > { %s3442_s7 = scalar_lea.vmem %s4610_s0, %s3163_s30  ;;  %s2847_s10 = sadd.s32 256, %s3163_s30 }
  0x1b   : > { %v3225_v0 = vld [vmem:[%s3442_s7 + $0x98] sm:$0xff]   ;;  %v3446_v1 = vld [vmem:[%s3442_s7 + $0xa0] sm:$0xff]   ;;  %v3449_v2 = vld [vmem:[%s3442_s7 + $0x90] sm:$0xff]   ;;  %s3667_s13 = scalar_lea.vmem %s4611_s1, %s2847_s10  ;;  %s4553_s30 = scalar_lea.hbm %s4614_s4, %s2848_s22 }
  0x1c   : > { %v1108_v3 = vrot.slane %v3225_v0, 1  ;;  %v1110_v4 = vrot.slane %v3446_v1, 1  ;;  %582 = vst.msk [vmem:[#allocation2 + $0x98] sm:$0xff] %vm562_vm2, %v3225_v0  ;;  %583 = vst.msk [vmem:[#allocation2 + $0xa0] sm:$0xff] %vm562_vm2, %v3446_v1  ;;  %v1106_v5 = vrot.slane %v3449_v2, 1  ;;  %v3228_v6 = vld [vmem:[%s3442_s7 + $0x18] sm:$0xff]  }
  0x1d   : > { %581 = vst.msk [vmem:[#allocation2 + $0x90] sm:$0xff] %vm562_vm2, %v3449_v2  ;;  %v3463_v8 = vld [vmem:[%s3442_s7 + $0x20] sm:$0xff]   ;;  %v768_v9 = vshll.u32 %v3449_v2, 16  ;;  %v1076_v11 = vrot.slane %v3228_v6, 1  ;;  %v3471_v12 = vld [vmem:[%s3442_s7 + $0x10] sm:$0xff]   ;;  %v772_v13 = vshrl.u32 %v3449_v2, 16 }
  0x1e   : > { %v1111_v7 = vsel %vm1070_vm0, %v1108_v3, %v1110_v4  ;;  %v1109_v10 = vsel %vm1070_vm0, %v1106_v5, %v1108_v3  ;;  %v776_v14 = vshll.u32 %v3225_v0, 16  ;;  %566 = vst.msk [vmem:[#allocation2 + $0x18] sm:$0xff] %vm562_vm2, %v3228_v6  ;;  %v1078_v15 = vrot.slane %v3463_v8, 1  ;;  %567 = vst.msk [vmem:[#allocation2 + $0x20] sm:$0xff] %vm562_vm2, %v3463_v8  ;;  %v3485_v23 = vld [vmem:[%s3442_s7 + $0xa8] sm:$0xff]   ;;  %v3488_v24 = vld [vmem:[%s3442_s7 + $0xb0] sm:$0xff]  }
  0x1f   : > { %1172 = vrot.lane.b32.xlu0 %v1111_v7, %s3347_s8  ;;  %1170 = vrot.lane.b32.xlu1 %v1109_v10, %s3347_s8  ;;  %v3477_v16 = vrot.slane %v768_v9, 1  ;;  %v648_v17 = vshll.u32 %v3228_v6, 16  ;;  %v780_v18 = vshrl.u32 %v3225_v0, 16  ;;  %v1074_v19 = vrot.slane %v3471_v12, 1  ;;  %565 = vst.msk [vmem:[#allocation2 + $0x10] sm:$0xff] %vm562_vm2, %v3471_v12  ;;  %584 = vst.msk [vmem:[#allocation2 + $0xa8] sm:$0xff] %vm562_vm2, %v3485_v23 }
  0x20   : > { %v778_v20 = vrot.slane %v776_v14, 1  ;;  %v640_v21 = vshll.u32 %v3471_v12, 16  ;;  %v644_v22 = vshrl.u32 %v3471_v12, 16  ;;  %v1079_v25 = vsel %vm1070_vm0, %v1076_v11, %v1078_v15  ;;  %585 = vst.msk [vmem:[#allocation2 + $0xb0] sm:$0xff] %vm562_vm2, %v3488_v24  ;;  %v3512_v37 = vld [vmem:[%s3442_s7 + $0x28] sm:$0xff]   ;;  %v3518_v42 = vld [vmem:[%s3442_s7 + $0x30] sm:$0xff]  }
  0x21   : > { %v774_v26 = vor.u32 %v772_v13, %v3477_v16  ;;  %v650_v27 = vrot.slane %v648_v17, 1  ;;  %v784_v28 = vshll.u32 %v3446_v1, 16  ;;  %v1077_v29 = vsel %vm1070_vm0, %v1074_v19, %v1076_v11  ;;  %v3521_v43 = vld [vmem:[%s3442_s7 + $0xb8] sm:$0xff]   ;;  %568 = vst.msk [vmem:[#allocation2 + $0x28] sm:$0xff] %vm562_vm2, %v3512_v37  ;;  %v3528_v48 = vld [vmem:[%s3442_s7 + $0xc0] sm:$0xff]   ;;  %569 = vst.msk [vmem:[#allocation2 + $0x30] sm:$0xff] %vm562_vm2, %v3518_v42 }
  0x22   : > { %v3500_v30 = vrot.slane %v640_v21, 1  ;;  %v782_v31 = vor.u32 %v780_v18, %v778_v20  ;;  %v652_v32 = vshrl.u32 %v3228_v6, 16  ;;  %v656_v35 = vshll.u32 %v3463_v8, 16  ;;  %586 = vst.msk [vmem:[#allocation2 + $0xb8] sm:$0xff] %vm562_vm2, %v3521_v43  ;;  %v3539_v52 = vld [vmem:[%s3442_s7 + $0x38] sm:$0xff]   ;;  %587 = vst.msk [vmem:[#allocation2 + $0xc0] sm:$0xff] %vm562_vm2, %v3528_v48 }
  0x23   : > { %1140 = vrot.lane.b32.xlu1 %v1079_v25, %s3347_s8  ;;  %1138 = vrot.lane.b32.xlu0 %v1077_v29, %s3347_s8  ;;  %v779_v33 = vsel %vm623_vm1, %v774_v26, %v778_v20  ;;  %v786_v34 = vrot.slane %v784_v28, 1  ;;  %v788_v36 = vshrl.u32 %v3446_v1, 16  ;;  %v792_v40 = vshll.u32 %v3485_v23, 16  ;;  %v3546_v57 = vld [vmem:[%s3442_s7 + $0x40] sm:$0xff]   ;;  %570 = vst.msk [vmem:[#allocation2 + $0x38] sm:$0xff] %vm562_vm2, %v3539_v52  ;;  %v3552_v59 = vld [vmem:[%s3442_s7 + $0xc8] sm:$0xff]  }
  0x24   : > { %v646_v38 = vor.u32 %v644_v22, %v3500_v30  ;;  %v654_v39 = vor.u32 %v652_v32, %v650_v27  ;;  %v796_v41 = vshrl.u32 %v3485_v23, 16  ;;  %v658_v44 = vrot.slane %v656_v35, 1  ;;  %571 = vst.msk [vmem:[#allocation2 + $0x40] sm:$0xff] %vm562_vm2, %v3546_v57  ;;  %v3563_v6 = vld [vmem:[%s3442_s7 + $0xd0] sm:$0xff]   ;;  %588 = vst.msk [vmem:[#allocation2 + $0xc8] sm:$0xff] %vm562_vm2, %v3552_v59  ;;  %v3568_v7 = vld [vmem:[%s3442_s7 + $0x48] sm:$0xff]  }
  0x25   : > { %v800_v45 = vshll.u32 %v3488_v24, 16  ;;  %v794_v47 = vrot.slane %v792_v40, 1  ;;  %v660_v50 = vshrl.u32 %v3463_v8, 16  ;;  %v664_v51 = vshll.u32 %v3512_v37, 16  ;;  %589 = vst.msk [vmem:[#allocation2 + $0xd0] sm:$0xff] %vm562_vm2, %v3563_v6  ;;  %v3579_v11 = vld [vmem:[%s3442_s7 + $0x50] sm:$0xff]  }
  0x26   : > { %v651_v46 = vsel %vm623_vm1, %v646_v38, %v650_v27  ;;  %v787_v53 = vsel %vm623_vm1, %v782_v31, %v786_v34  ;;  %v659_v54 = vsel %vm623_vm1, %v654_v39, %v658_v44  ;;  %v790_v55 = vor.u32 %v788_v36, %v786_v34  ;;  %572 = vst.msk [vmem:[#allocation2 + $0x48] sm:$0xff] %vm562_vm2, %v3568_v7  ;;  %v3586_v20 = vld [vmem:[%s3442_s7 + $0xd8] sm:$0xff]   ;;  %v3610_v31 = vld [vmem:[%s3442_s7 + $0x60] sm:$0xff]   ;;  %v3632_v40 = vld [vmem:[%s3442_s7 + $0xe8] sm:$0xff]  }
  0x27   : > { %915 = vrot.lane.b32.xlu0 %v779_v33, %s3348_s9  ;;  %883 = vrot.lane.b32.xlu1 %v651_v46, %s3348_s9  ;;  %v802_v49 = vrot.slane %v800_v45, 1  ;;  %v798_v56 = vor.u32 %v796_v41, %v794_v47  ;;  %v1112_v58 = vrot.slane %v3485_v23, 1  ;;  %v666_v60 = vrot.slane %v664_v51, 1  ;;  %573 = vst.msk [vmem:[#allocation2 + $0x50] sm:$0xff] %vm562_vm2, %v3579_v11  ;;  %v3595_v21 = vld [vmem:[%s3442_s7 + $0x58] sm:$0xff]   ;;  %590 = vst.msk [vmem:[#allocation2 + $0xd8] sm:$0xff] %vm562_vm2, %v3586_v20 }
  0x28   : > { %v668_v61 = vshrl.u32 %v3512_v37, 16  ;;  %v795_v62 = vsel %vm623_vm1, %v790_v55, %v794_v47  ;;  %v662_v0 = vor.u32 %v660_v50, %v658_v44  ;;  %v672_v3 = vshll.u32 %v3518_v42, 16  ;;  %574 = vst.msk [vmem:[#allocation2 + $0x58] sm:$0xff] %vm562_vm2, %v3595_v21  ;;  %v3617_v32 = vld [vmem:[%s3442_s7 + $0xf8] sm:$0xff]   ;;  %575 = vst.msk [vmem:[#allocation2 + $0x60] sm:$0xff] %vm562_vm2, %v3610_v31  ;;  %v3637_v8 = vld [vmem:[%s3442_s7 + $0xf0] sm:$0xff]  }
  0x29   : > { %v803_v63 = vsel %vm623_vm1, %v798_v56, %v802_v49  ;;  %v1113_v9 = vsel %vm1070_vm0, %v1110_v4, %v1112_v58  ;;  %v1114_v10 = vrot.slane %v3488_v24, 1  ;;  %v808_v18 = vshll.u32 %v3521_v43, 16  ;;  %v3592_v4 = vld [vmem:[%s3442_s7 + $0xe0] sm:$0xff]   ;;  %594 = vst.msk [vmem:[#allocation2 + $0xf8] sm:$0xff] %vm562_vm2, %v3617_v32  ;;  %v3645_v41 = vld [vmem:[%s3442_s7 + $0x70] sm:$0xff]   ;;  %592 = vst.msk [vmem:[#allocation2 + $0xe8] sm:$0xff] %vm562_vm2, %v3632_v40 }
  0x2a   : > { %v667_v13 = vsel %vm623_vm1, %v662_v0, %v666_v60  ;;  %v670_v14 = vor.u32 %v668_v61, %v666_v60  ;;  %v674_v17 = vrot.slane %v672_v3, 1  ;;  %v1080_v1 = vrot.slane %v3512_v37, 1  ;;  %591 = vst.msk [vmem:[#allocation2 + $0xe0] sm:$0xff] %vm562_vm2, %v3592_v4  ;;  %593 = vst.msk [vmem:[#allocation2 + $0xf0] sm:$0xff] %vm562_vm2, %v3637_v8 }
  0x2b   : > { %917 = vrot.lane.b32.xlu0 %v787_v53, %s3348_s9  ;;  %885 = vrot.lane.b32.xlu1 %v659_v54, %s3348_s9  ;;  %v1115_v22 = vsel %vm1070_vm0, %v1112_v58, %v1114_v10  ;;  %v1082_v23 = vrot.slane %v3518_v42, 1  ;;  %v804_v25 = vshrl.u32 %v3488_v24, 16  ;;  %v810_v27 = vrot.slane %v808_v18, 1  ;;  %577 = vst.msk [vmem:[#allocation2 + $0x70] sm:$0xff] %vm562_vm2, %v3645_v41  ;;  %v3704_v18 = vld [vmem:[%s3442_s7 + $0x88] sm:$0xff]  }
  0x2c   : > { %v675_v26 = vsel %vm623_vm1, %v670_v14, %v674_v17  ;;  %v812_v28 = vshrl.u32 %v3521_v43, 16  ;;  %v816_v29 = vshll.u32 %v3528_v48, 16  ;;  %v1081_v33 = vsel %vm1070_vm0, %v1078_v15, %v1080_v1  ;;  %v3640_v15 = vld [vmem:[%s3442_s7 + $0x68] sm:$0xff]   ;;  %580 = vst.msk [vmem:[#allocation2 + $0x88] sm:$0xff] %vm562_vm2, %v3704_v18 }
  0x2d   : > { %v1083_v34 = vsel %vm1070_vm0, %v1080_v1, %v1082_v23  ;;  %v806_v35 = vor.u32 %v804_v25, %v802_v49  ;;  %v676_v38 = vshrl.u32 %v3518_v42, 16  ;;  %v680_v39 = vshll.u32 %v3539_v52, 16  ;;  %v3656_v49 = vld [vmem:[%s3442_s7 + $0x78] sm:$0xff]   ;;  %576 = vst.msk [vmem:[#allocation2 + $0x68] sm:$0xff] %vm562_vm2, %v3640_v15 }
  0x2e   : > { %v814_v36 = vor.u32 %v812_v28, %v810_v27  ;;  %v818_v37 = vrot.slane %v816_v29, 1  ;;  %v1116_v45 = vrot.slane %v3521_v43, 1  ;;  %v684_v46 = vshrl.u32 %v3539_v52, 16  ;;  %v3672_v43 = vld [vmem:[%s3442_s7 + $0x80] sm:$0xff]   ;;  %578 = vst.msk [vmem:[#allocation2 + $0x78] sm:$0xff] %vm562_vm2, %v3656_v49 }
  0x2f   : > { %919 = vrot.lane.b32.xlu0 %v795_v62, %s3348_s9  ;;  %921 = vrot.lane.b32.xlu1 %v803_v63, %s3348_s9  ;;  %v811_v44 = vsel %vm623_vm1, %v806_v35, %v810_v27  ;;  %v688_v47 = vshll.u32 %v3546_v57, 16  ;;  %v678_v51 = vor.u32 %v676_v38, %v674_v17  ;;  %v682_v53 = vrot.slane %v680_v39, 1  ;;  %v3685_v62 = vld [vmem:[%s3667_s13] sm:$0xff]   ;;  %579 = vst.msk [vmem:[#allocation2 + $0x80] sm:$0xff] %vm562_vm2, %v3672_v43  ;;  %v3734_v39 = vld [vmem:[%s3442_s7 + $0x8] sm:$0xff]  }
  0x30   : > { %v819_v50 = vsel %vm623_vm1, %v814_v36, %v818_v37  ;;  %v824_v54 = vshll.u32 %v3552_v59, 16  ;;  %v1118_v55 = vrot.slane %v3528_v48, 1  ;;  %v1117_v56 = vsel %vm1070_vm0, %v1114_v10, %v1116_v45  ;;  %619 = vst.msk [vmem:[#allocation2 + $0x100] sm:$0xff] %vm562_vm2, %v3685_v62  ;;  %v3726_v35 = vld [vmem:[%s3442_s7] sm:$0xff]   ;;  %564 = vst.msk [vmem:[#allocation2 + $0x8] sm:$0xff] %vm562_vm2, %v3734_v39  ;;  %s3271_s7 = sshll.u32 %s3350_s6, 4  ;;  %s3272_s7 = int_to_ptr.vmem [resolvable:$false] %s3271_s7 }
  0x31   : > { %v690_v58 = vrot.slane %v688_v47, 1  ;;  %v820_v60 = vshrl.u32 %v3528_v48, 16  ;;  %v828_v61 = vshrl.u32 %v3552_v59, 16  ;;  %v683_v63 = vsel %vm623_vm1, %v678_v51, %v682_v53  ;;  %v3697_v48 = vld [vmem:[%s3667_s13 + $0x10] sm:$0xff]   ;;  %563 = vst.msk [vmem:[#allocation2] sm:$0xff] %vm562_vm2, %v3726_v35  ;;  %s3273_s10 = scalar_lea.vmem %s3272_s7, 8192 }
  0x32   : > { %v686_v0 = vor.u32 %v684_v46, %v682_v53  ;;  %v826_v3 = vrot.slane %v824_v54, 1  ;;  %v692_v24 = vshrl.u32 %v3546_v57, 16  ;;  %v696_v10 = vshll.u32 %v3568_v7, 16  ;;  %621 = vst.msk [vmem:[#allocation2 + $0x110] sm:$0xff] %vm562_vm2, %v3697_v48 }
  0x33   : > { %1174 = vrot.lane.b32.xlu0 %v1113_v9, %s3347_s8  ;;  %887 = vrot.lane.b32.xlu1 %v667_v13, %s3348_s9  ;;  %v832_v9 = vshll.u32 %v3563_v6, 16  ;;  %v3694_v13 = vld [vmem:[%s3667_s13 + $0x8] sm:$0xff]   ;;  %v1084_v14 = vrot.slane %v3539_v52, 1  ;;  %v1086_v17 = vrot.slane %v3546_v57, 1  ;;  %v1119_v1 = vsel %vm1070_vm0, %v1116_v45, %v1118_v55 }
  0x34   : > { %v1120_v25 = vrot.slane %v3552_v59, 1  ;;  %620 = vst.msk [vmem:[#allocation2 + $0x108] sm:$0xff] %vm562_vm2, %v3694_v13  ;;  %v691_v52 = vsel %vm623_vm1, %v686_v0, %v690_v58  ;;  %v830_v57 = vor.u32 %v828_v61, %v826_v3  ;;  %v700_v28 = vshrl.u32 %v3568_v7, 16 }
  0x35   : > { %v3716_v27 = vrot.slane %v832_v9, 1  ;;  %v694_v59 = vor.u32 %v692_v24, %v690_v58  ;;  %v698_v29 = vrot.slane %v696_v10, 1  ;;  %v1085_v36 = vsel %vm1070_vm0, %v1082_v23, %v1084_v14 }
  0x36   : > { %v704_v38 = vshll.u32 %v3579_v11, 16  ;;  %v1121_v45 = vsel %vm1070_vm0, %v1118_v55, %v1120_v25  ;;  %v1088_v46 = vrot.slane %v3568_v7, 1  ;;  %v1090_v47 = vrot.slane %v3579_v11, 1 }
  0x37   : > { %1176 = vrot.lane.b32.xlu0 %v1115_v22, %s3347_s8  ;;  %889 = vrot.lane.b32.xlu1 %v675_v26, %s3348_s9  ;;  %v822_v22 = vor.u32 %v820_v60, %v818_v37  ;;  %v1122_v26 = vrot.slane %v3563_v6, 1  ;;  %v1087_v37 = vsel %vm1070_vm0, %v1084_v14, %v1086_v17  ;;  %v835_v23 = vsel %vm623_vm1, %v830_v57, %v3716_v27 }
  0x38   : > { %v699_v51 = vsel %vm623_vm1, %v694_v59, %v698_v29  ;;  %v702_v53 = vor.u32 %v700_v28, %v698_v29  ;;  %v740_v55 = vshrl.u32 %v3645_v41, 16  ;;  %v840_v7 = vshll.u32 %v3586_v20, 16 }
  0x39   : > { %v3743_v42 = vsel %vm1070_vm0, %v1120_v25, %v1122_v26  ;;  %v744_v58 = vshll.u32 %v3656_v49, 16  ;;  %v748_v60 = vshrl.u32 %v3656_v49, 16  ;;  %v1098_v61 = vrot.slane %v3645_v41, 1 }
  0x3a   : > { %v752_v0 = vshll.u32 %v3672_v43, 16  ;;  %v1102_v24 = vrot.slane %v3672_v43, 1  ;;  %v1019_v10 = vshrl.u32 %v3685_v62, 16  ;;  %v1021_v14 = vshll.u32 %v3685_v62, 16 }
  0x3b   : > { %1142 = vrot.lane.b32.xlu0 %v1081_v33, %s3347_s8  ;;  %1144 = vrot.lane.b32.xlu1 %v1083_v34, %s3347_s8  ;;  %v736_v33 = vshll.u32 %v3645_v41, 16  ;;  %v3258_v34 = vld [vmem:[%s4612_s2 + $0xc] sm:$0xff]   ;;  %v746_v9 = vrot.slane %v744_v58, 1  ;;  %v712_v2 = vshll.u32 %v3595_v21, 16  ;;  %v716_v12 = vshrl.u32 %v3595_v21, 16 }
  0x3c   : > { %2951 = vmatprep.subr.bf16.mxu0 %v3258_v34  ;;  %3155 = vmatprep.subr.bf16.mxu1 %v3258_v34  ;;  %v1023_v59 = vrot.slane %v1021_v14, 1  ;;  %v627_v14 = vshll.u32 %v3726_v35, 16  ;;  %v1034_v41 = vshll.u32 %v3697_v48, 16 }
  0x3d   : > { %v3755_v54 = vrot.slane %v736_v33, 1  ;;  %2952 = vmatpush3.bf16.msra.mxu0 %v3258_v34  ;;  %3157 = vmatpush3.bf16.msra.mxu1 %v3258_v34  ;;  %v750_v57 = vor.u32 %v748_v60, %v746_v9  ;;  %v1266_v33 = vrot.slane %v3685_v62, 1  ;;  %v1267_v34 = vrot.slane %v3694_v13, 1 }
  0x3f   : > { %923 = vrot.lane.b32.xlu0 %v811_v44, %s3348_s9  ;;  %925 = vrot.lane.b32.xlu1 %v819_v50, %s3348_s9  ;;  %v827_v44 = vsel %vm623_vm1, %v822_v22, %v826_v3  ;;  %v836_v50 = vshrl.u32 %v3563_v6, 16  ;;  %v1100_v3 = vrot.slane %v3656_v49, 1  ;;  %v754_v22 = vrot.slane %v752_v0, 1 }
  0x40   : > { %v3808_v62 = vsel %vm1070_vm0, %v1266_v33, %v1267_v34  ;;  %v1104_v0 = vrot.slane %v3704_v18, 1  ;;  %v872_v6 = vshll.u32 %v3617_v32, 16 }
  0x41   : > { %v3778_v25 = vsel %vm1070_vm0, %v1098_v61, %v1100_v3  ;;  %v3785_v28 = vsel %vm1070_vm0, %v1100_v3, %v1102_v24  ;;  %v625_v3 = vshrl.u32 %v3726_v35, 16 }
  0x43   : > { %1178 = vrot.lane.b32.xlu0 %v1117_v56, %s3347_s8  ;;  %891 = vrot.lane.b32.xlu1 %v683_v63, %s3348_s9  ;;  %v3758_v56 = vrot.slane %v704_v38, 1  ;;  %v742_v63 = vor.u32 %v740_v55, %v3755_v54  ;;  %v756_v38 = vshrl.u32 %v3672_v43, 16  ;;  %v838_v55 = vor.u32 %v836_v50, %v3716_v27 }
  0x44   : > { %v842_v27 = vrot.slane %v840_v7, 1  ;;  %v848_v50 = vshll.u32 %v3592_v4, 16 }
  0x45   : > { %v3782_v49 = vsel %vm623_vm1, %v742_v63, %v746_v9  ;;  %v758_v60 = vor.u32 %v756_v38, %v754_v22  ;;  %v764_v63 = vshrl.u32 %v3704_v18, 16 }
  0x47   : > { %1180 = vrot.lane.b32.xlu0 %v1119_v1, %s3347_s8  ;;  %893 = vrot.lane.b32.xlu1 %v691_v52, %s3348_s9  ;;  %v3773_v1 = vsel %vm1070_vm0, %v1086_v17, %v1088_v46  ;;  %v1026_v52 = vshll.u32 %v3694_v13, 16  ;;  %v1091_v17 = vsel %vm1070_vm0, %v1088_v46, %v1090_v47  ;;  %v844_v46 = vshrl.u32 %v3586_v20, 16 }
  0x49   : > { %v3792_v29 = vrot.slane %v1026_v52, 1  ;;  %v3829_v52 = vsel %vm1070_vm0, %v1102_v24, %v1104_v0  ;;  %v1072_v24 = vrot.slane %v3734_v39, 1  ;;  %v846_v33 = vor.u32 %v844_v46, %v842_v27 }
  0x4a   : > { %v1124_v46 = vrot.slane %v3586_v20, 1  ;;  %v1126_v20 = vrot.slane %v3592_v4, 1 }
  0x4b   : > { %1146 = vrot.lane.b32.xlu0 %v1085_v36, %s3347_s8  ;;  %1148 = vrot.lane.b32.xlu1 %v1087_v37, %s3347_s8  ;;  %v3797_v36 = vsel %vm623_vm1, %v750_v57, %v754_v22  ;;  %v1024_v37 = vor.u32 %v1023_v59, %v1019_v10  ;;  %v632_v22 = vshll.u32 %v3734_v39, 16  ;;  %v629_v57 = vrot.slane %v627_v14, 1 }
  0x4c   : > { %v856_v14 = vshll.u32 %v3632_v40, 16 }
  0x4d   : > { %v3812_v58 = vsel %vm623_vm1, %v1024_v37, %v3792_v29  ;;  %v634_v59 = vrot.slane %v632_v22, 1  ;;  %v850_v37 = vrot.slane %v848_v50, 1  ;;  %v630_v38 = vor.u32 %v629_v57, %v625_v3 }
  0x4e   : > { %v1092_v50 = vrot.slane %v3595_v21, 1 }
  0x4f   : > { %927 = vrot.lane.b32.xlu0 %v827_v44, %s3348_s9  ;;  %929 = vrot.lane.b32.xlu1 %v835_v23, %s3348_s9  ;;  %v760_v44 = vshll.u32 %v3704_v18, 16  ;;  %v707_v23 = vsel %vm623_vm1, %v702_v53, %v3758_v56  ;;  %v3261_v53 = vld [vmem:[%s4612_s2 + $0x14] ss:$0 sps:$4 sm:$0xff]   ;;  %v636_v18 = vshrl.u32 %v3734_v39, 16 }
  0x50   : > { %3159 = vmatprep.subr.msk.bf16.mxu0 %vm1437_vm3, %v3261_v53  ;;  %3160 = vmatprep.subr.msk.bf16.mxu1 %vm1437_vm3, %v3261_v53  ;;  %v1093_v21 = vsel %vm1070_vm0, %v1090_v47, %v1092_v50  ;;  %v724_v47 = vshrl.u32 %v3610_v31, 16 }
  0x51   : > { %v762_v43 = vrot.slane %v760_v44, 1  ;;  %v638_v44 = vor.u32 %v636_v18, %v634_v59  ;;  %v874_v18 = vrot.slane %v872_v6, 1 }
  0x53   : > { %1182 = vrot.lane.b32.xlu0 %v1121_v45, %s3347_s8  ;;  %895 = vrot.lane.b32.xlu1 %v699_v51, %s3348_s9  ;;  %v3824_v9 = vsel %vm623_vm1, %v758_v60, %v762_v43  ;;  %v766_v10 = vor.u32 %v764_v63, %v762_v43  ;;  %v3834_v45 = vsel %vm1070_vm0, %v1104_v0, %v1106_v5  ;;  %v708_v51 = vshrl.u32 %v3579_v11, 16 }
  0x54   : > { %v1071_v5 = vrot.slane %v3726_v35, 1  ;;  %v3860_v35 = vsel %vm623_vm1, %v630_v38, %v634_v59  ;;  %v3864_v39 = vsel %vm623_vm1, %v638_v44, %v3500_v30  ;;  %v714_v63 = vrot.slane %v712_v2, 1  ;;  %v3878_v30 = vld [vmem:[%s4612_s2] sm:$0xff]  }
  0x55   : > { %v3840_v7 = vsel %vm623_vm1, %v766_v10, %v3477_v16  ;;  %v1439_v16 = vsel %vm1437_vm3, %v3261_v53, 0  ;;  %v710_v43 = vor.u32 %v708_v51, %v3758_v56  ;;  %v720_v53 = vshll.u32 %v3610_v31, 16 }
  0x56   : > { %2954 = vmatpush3.bf16.msra.mxu0 %v1439_v16  ;;  %3158 = vmatpush3.bf16.msra.mxu1 %v1439_v16  ;;  %v3852_v60 = vsel %vm1070_vm0, %v1071_v5, %v1072_v24  ;;  %v1125_v56 = vsel %vm1070_vm0, %v1122_v26, %v1124_v46  ;;  %v1094_v0 = vrot.slane %v3610_v31, 1  ;;  %v1127_v26 = vsel %vm1070_vm0, %v1124_v46, %v1126_v20 }
  0x57   : > { %1184 = vrot.lane.b32.xlu0 %v3743_v42, %s3347_s8  ;;  %897 = vrot.lane.b32.xlu1 %v707_v23, %s3348_s9  ;;  %v3857_v42 = vsel %vm1070_vm0, %v1072_v24, %v1074_v19  ;;  %v843_v23 = vsel %vm623_vm1, %v838_v55, %v842_v27  ;;  %v851_v19 = vsel %vm623_vm1, %v846_v33, %v850_v37  ;;  %v722_v27 = vrot.slane %v720_v53, 1 }
  0x58   : > { %v718_v55 = vor.u32 %v716_v12, %v714_v63  ;;  %3019 = vmatprep.subr.bf16.mxu1 %v3878_v30  ;;  %v852_v10 = vshrl.u32 %v3592_v4, 16  ;;  %v1095_v22 = vsel %vm1070_vm0, %v1092_v50, %v1094_v0  ;;  %v876_v51 = vshrl.u32 %v3617_v32, 16  ;;  %v3955_v50 = vld [vmem:[%s3667_s13 + $0x18] sm:$0xff]  }
  0x59   : > { %v858_v59 = vrot.slane %v856_v14, 1  ;;  %v860_v2 = vshrl.u32 %v3632_v40, 16  ;;  %v864_v4 = vshll.u32 %v3637_v8, 16  ;;  %v1128_v11 = vrot.slane %v3632_v40, 1  ;;  %622 = vst.msk [vmem:[#allocation2 + $0x118] sm:$0xff] %vm562_vm2, %v3955_v50 }
  0x5a   : > { %v723_v3 = vsel %vm623_vm1, %v718_v55, %v722_v27  ;;  %v854_v57 = vor.u32 %v852_v10, %v850_v37  ;;  %v878_v5 = vor.u32 %v876_v51, %v874_v18  ;;  %v728_v37 = vshll.u32 %v3640_v15, 16 }
  0x5b   : > { %1150 = vrot.lane.b32.xlu0 %v3773_v1, %s3347_s8  ;;  %1152 = vrot.lane.b32.xlu1 %v1091_v17, %s3347_s8  ;;  %v3883_v1 = vld [vmem:[%s4612_s2 + $0x18] sm:$0xff]   ;;  %v715_v17 = vsel %vm623_vm1, %v710_v43, %v714_v63  ;;  %v862_v16 = vor.u32 %v860_v2, %v858_v59  ;;  %v866_v33 = vrot.slane %v864_v4, 1  ;;  %v1129_v38 = vsel %vm1070_vm0, %v1126_v20, %v1128_v11 }
  0x5c   : > { %3087 = vmatprep.subr.bf16.mxu0 %v3883_v1  ;;  %v859_v24 = vsel %vm623_vm1, %v854_v57, %v858_v59  ;;  %v1130_v44 = vrot.slane %v3637_v8, 1  ;;  %v726_v46 = vor.u32 %v724_v47, %v722_v27  ;;  %v730_v40 = vrot.slane %v728_v37, 1 }
  0x5d   : > { %v732_v31 = vshrl.u32 %v3640_v15, 16  ;;  %v1096_v63 = vrot.slane %v3640_v15, 1  ;;  %v868_v53 = vshrl.u32 %v3637_v8, 16  ;;  %v1132_v55 = vrot.slane %v3617_v32, 1 }
  0x5e   : > { %v1131_v12 = vsel %vm1070_vm0, %v1128_v11, %v1130_v44  ;;  %v1030_v27 = vshrl.u32 %v3694_v13, 16  ;;  %v1046_v14 = vshrl.u32 %v3955_v50, 16  ;;  %v1271_v59 = vrot.slane %v3955_v50, 1 }
  0x5f   : > { %931 = vrot.lane.b32.xlu0 %v843_v23, %s3348_s9  ;;  %933 = vrot.lane.b32.xlu1 %v851_v19, %s3348_s9  ;;  %v867_v23 = vsel %vm623_vm1, %v862_v16, %v866_v33  ;;  %v731_v19 = vsel %vm623_vm1, %v726_v46, %v730_v40  ;;  %v734_v43 = vor.u32 %v732_v31, %v730_v40 }
  0x60   : > { %v1099_v15 = vsel %vm1070_vm0, %v1096_v63, %v1098_v61  ;;  %v1032_v32 = vor.u32 %v1030_v27, %v3792_v29  ;;  %v1036_v61 = vrot.slane %v1034_v41, 1 }
  0x61   : > { %v739_v20 = vsel %vm623_vm1, %v734_v43, %v3755_v54  ;;  %v1133_v54 = vsel %vm1070_vm0, %v1130_v44, %v1132_v55 }
  0x63   : > { %1186 = vrot.lane.b32.xlu0 %v1125_v56, %s3347_s8  ;;  %899 = vrot.lane.b32.xlu1 %v715_v17, %s3348_s9  ;;  %v1097_v56 = vsel %vm1070_vm0, %v1094_v0, %v1096_v63  ;;  %v870_v17 = vor.u32 %v868_v53, %v866_v33 }
  0x65   : > { %v875_v8 = vsel %vm623_vm1, %v870_v17, %v874_v18  ;;  %v3265_v18 = vld [vmem:[%s4612_s2 + $0x20] ss:$0 sps:$4 sm:$0xff]  }
  0x66   : > { %v2115_v11 = vsel %vm1437_vm3, %v3265_v18, 0 }
  0x67   : > { %1188 = vrot.lane.b32.xlu0 %v1127_v26, %s3347_s8  ;;  %901 = vrot.lane.b32.xlu1 %v723_v3, %s3348_s9 }
  0x6b   : > { %1154 = vrot.lane.b32.xlu0 %v1093_v21, %s3347_s8  ;;  %1156 = vrot.lane.b32.xlu1 %v1095_v22, %s3347_s8  ;;  %v3264_v22 = vld [vmem:[%s4612_s2 + $0x8] ss:$0 sps:$4 sm:$0xff]  }
  0x6f   : > { %941 = vrot.lane.b32.xlu0 %v878_v5, %s3348_s9  ;;  %935 = vrot.lane.b32.xlu1 %v859_v24, %s3348_s9  ;;  %v1714_v5 = vsel %vm1437_vm3, %v3264_v22, 0 }
  0x73   : > { %937 = vrot.lane.b32.xlu0 %v867_v23, %s3348_s9  ;;  %1190 = vrot.lane.b32.xlu1 %v1129_v38, %s3347_s8 }
  0x77   : > { %903 = vrot.lane.b32.xlu0 %v731_v19, %s3348_s9  ;;  %1192 = vrot.lane.b32.xlu1 %v1131_v12, %s3347_s8 }
  0x7b   : > { %905 = vrot.lane.b32.xlu0 %v739_v20, %s3348_s9  ;;  %1158 = vrot.lane.b32.xlu1 %v1097_v56, %s3347_s8 }
  0x7f   : > { %1160 = vrot.lane.b32.xlu0 %v1099_v15, %s3347_s8  ;;  %939 = vrot.lane.b32.xlu1 %v875_v8, %s3348_s9 }
  0x83   : > { %1194 = vrot.lane.b32.xlu0 %v1133_v54, %s3347_s8  ;;  %907 = vrot.lane.b32.xlu1 %v3782_v49, %s3348_s9  ;;  %v1037_v49 = vsel %vm623_vm1, %v1032_v32, %v1036_v61 }
  0x87   : > { %1196 = vrot.lane.b32.xlu0 %v1132_v55, %s3347_s8  ;;  %909 = vrot.lane.b32.xlu1 %v3797_v36, %s3348_s9  ;;  %v1269_v36 = vrot.slane %v3697_v48, 1 }
  0x8b   : > { %1162 = vrot.lane.b32.xlu0 %v3778_v25, %s3347_s8  ;;  %1164 = vrot.lane.b32.xlu1 %v3785_v28, %s3347_s8  ;;  %v1270_v25 = vsel %vm1070_vm0, %v1267_v34, %v1269_v36 }
  0x8f   : > { %1049 = vrot.lane.b32.xlu0 %v3812_v58, %s3348_s9  ;;  %1051 = vrot.lane.b32.xlu1 %v1037_v49, %s3348_s9 }
  0x91   : > { %v1173_v29 = vpop.permute.xlu0 %1172  ;;  %v1171_v0 = vpop.permute.xlu1 %1170 }
  0x93   : > { %1273 = vrot.lane.b32.xlu0 %v3808_v62, %s3347_s8  ;;  %911 = vrot.lane.b32.xlu1 %v3824_v9, %s3348_s9  ;;  %v1042_v9 = vshll.u32 %v3955_v50, 16 }
  0x95   : > { %v1141_v28 = vpop.permute.xlu1 %1140  ;;  %v1139_v58 = vpop.permute.xlu0 %1138  ;;  %v1044_v10 = vrot.slane %v1042_v9, 1 }
  0x97   : > { %1275 = vrot.lane.b32.xlu0 %v1270_v25, %s3347_s8  ;;  %913 = vrot.lane.b32.xlu1 %v3840_v7, %s3348_s9  ;;  %v1048_v57 = vor.u32 %v1046_v14, %v1044_v10 }
  0x99   : > { %v916_v6 = vpop.permute.xlu0 %915  ;;  %v884_v62 = vpop.permute.xlu1 %883 }
  0x9a   : > { %994 = vst.msk [vmem:[#allocation2 + $0x90] sm:$0xff] %vm975_vm4, %v916_v6  ;;  %978 = vst.msk [vmem:[#allocation2 + $0x10] sm:$0xff] %vm975_vm4, %v884_v62 }
  0x9b   : > { %1249 = vst.msk [vmem:[#allocation2 + $0x90] sm:$0xff] %vm1230_vm5, %v1171_v0  ;;  %1233 = vst.msk [vmem:[#allocation2 + $0x10] sm:$0xff] %vm1230_vm5, %v1139_v58  ;;  %1166 = vrot.lane.b32.xlu0 %v3829_v52, %s3347_s8  ;;  %1168 = vrot.lane.b32.xlu1 %v3834_v45, %s3347_s8  ;;  %v1038_v52 = vshrl.u32 %v3697_v48, 16 }
  0x9d   : > { %v918_v13 = vpop.permute.xlu0 %917  ;;  %v886_v34 = vpop.permute.xlu1 %885 }
  0x9e   : > { %995 = vst.msk [vmem:[#allocation2 + $0x98] sm:$0xff] %vm975_vm4, %v918_v13  ;;  %979 = vst.msk [vmem:[#allocation2 + $0x18] sm:$0xff] %vm975_vm4, %v886_v34  ;;  %v1009_v34 = vld [vmem:[#allocation2 + $0xf8] sm:$0xff] }
  0x9f   : > { %1250 = vst.msk [vmem:[#allocation2 + $0x98] sm:$0xff] %vm1230_vm5, %v1173_v29  ;;  %1234 = vst.msk [vmem:[#allocation2 + $0x18] sm:$0xff] %vm1230_vm5, %v1141_v28  ;;  %879 = vrot.lane.b32.xlu0 %v3860_v35, %s3348_s9  ;;  %881 = vrot.lane.b32.xlu1 %v3864_v39, %s3348_s9  ;;  %v1040_v35 = vor.u32 %v1038_v52, %v1036_v61 }
  0xa1   : > { %v920_v45 = vpop.permute.xlu0 %919  ;;  %v922_v7 = vpop.permute.xlu1 %921 }
  0xa2   : > { %996 = vst.msk [vmem:[#allocation2 + $0xa0] sm:$0xff] %vm975_vm4, %v920_v45  ;;  %997 = vst.msk [vmem:[#allocation2 + $0xa8] sm:$0xff] %vm975_vm4, %v922_v7  ;;  %v4000_v26 = vld [vmem:[#allocation2 + $0x10] sm:$0xff] }
  0xa3   : > { %v4002_v3 = vld [vmem:[#allocation2 + $0x90] sm:$0xff]  ;;  %2955 = vmatprep.mubr.msk.bf16.mxu0 %vm1340_vm6, %v4000_v26  ;;  %1134 = vrot.lane.b32.xlu0 %v3852_v60, %s3347_s8 }
  0xa4   : > { %2987 = vmatprep.mubr.msk.bf16.mxu1 %vm1340_vm6, %v4002_v3  ;;  %1136 = vrot.lane.b32.xlu1 %v3857_v42, %s3347_s8  ;;  %v1045_v42 = vsel %vm623_vm1, %v1040_v35, %v1044_v10 }
  0xa5   : > { %v1175_v39 = vpop.permute.xlu0 %1174  ;;  %v888_v21 = vpop.permute.xlu1 %887 }
  0xa6   : > { %1251 = vst.msk [vmem:[#allocation2 + $0xa0] sm:$0xff] %vm1230_vm5, %v1175_v39  ;;  %v4021_v51 = vld [vmem:[#allocation2 + $0x18] sm:$0xff] }
  0xa7   : > { %980 = vst.msk [vmem:[#allocation2 + $0x20] sm:$0xff] %vm975_vm4, %v888_v21  ;;  %v4023_v60 = vld [vmem:[#allocation2 + $0x98] sm:$0xff]  ;;  %2956 = vmatmul.mubr.msk.bf16.vlgmr.msra.gmra.mrb[0].mxu0 %vm1340_vm6, %v4021_v51  ;;  %1055 = vrot.lane.b32.xlu0 %v1048_v57, %s3348_s9 }
  0xa8   : > { %2988 = vmatmul.mubr.msk.bf16.vlgmr.msra.gmra.mrb[0].mxu1 %vm1340_vm6, %v4023_v60  ;;  %3088 = vmatpush3.bf16.msra.mxu0 %v3883_v1 }
  0xa9   : > { %3020 = vmatpush3.bf16.msra.mxu1 %v3878_v30  ;;  %v1177_v2 = vpop.permute.xlu0 %1176  ;;  %v890_v4 = vpop.permute.xlu1 %889  ;;  %3162 = vmatprep.subr.msk.bf16.mxu0 %vm1437_vm3, %v3265_v18  ;;  %v1272_v30 = vsel %vm1070_vm0, %v1269_v36, %v1271_v59 }
  0xaa   : > { %3161 = vmatprep.subr.msk.bf16.mxu1 %vm1437_vm3, %v3264_v22  ;;  %1252 = vst.msk [vmem:[#allocation2 + $0xa8] sm:$0xff] %vm1230_vm5, %v1177_v2  ;;  %1053 = vrot.lane.b32.xlu1 %v1045_v42, %s3348_s9 }
  0xab   : > { %981 = vst.msk [vmem:[#allocation2 + $0x28] sm:$0xff] %vm975_vm4, %v890_v4  ;;  %1277 = vrot.lane.b32.xlu0 %v1272_v30, %s3347_s8 }
  0xac   : > { %3090 = vmatpush3.bf16.msra.mxu0 %v2115_v11 }
  0xad   : > { %3022 = vmatpush3.bf16.msra.mxu1 %v1714_v5  ;;  %v1143_v1 = vpop.permute.xlu0 %1142  ;;  %v1145_v47 = vpop.permute.xlu1 %1144  ;;  %v4044_v24 = vld [vmem:[#allocation2 + $0xa0] sm:$0xff]  ;;  %v3349_v5 = vmov 0  }
  0xae   : > { %1235 = vst.msk [vmem:[#allocation2 + $0x20] sm:$0xff] %vm1230_vm5, %v1143_v1  ;;  %1236 = vst.msk [vmem:[#allocation2 + $0x28] sm:$0xff] %vm1230_vm5, %v1145_v47  ;;  %2991 = vmatprep.mubr.msk.bf16.mxu1 %vm1340_vm6, %v4044_v24  ;;  %1279 = vrot.lane.b32.xlu1 %v1271_v59, %s3347_s8  ;;  %s261_s8 = sand.u32 1, %s3329_s16  }
  0xaf   : > { %s2693_s14 = sshll.u32 %s261_s8, 8  ;;  %s4563_s18 = scalar_lea.sflag [#allocation4], %s261_s8 }
  0xb0   : > { %s4427_s21 = scalar_lea.vmem [#allocation3], %s2693_s14 }
  0xb1   : > { %v924_v48 = vpop.permute.xlu0 %923  ;;  %v926_v16 = vpop.permute.xlu1 %925  ;;  %v4052_v33 = vld [vmem:[#allocation2 + $0xa8] sm:$0xff]  ;;  %s2591_s24 = sshll.u32 %s4427_s21, 4  ;;  %s4557_s24 = int_to_ptr.vmem [resolvable:$true] %s2591_s24 }
  0xb2   : > { %998 = vst.msk [vmem:[#allocation2 + $0xb0] sm:$0xff] %vm975_vm4, %v924_v48  ;;  %999 = vst.msk [vmem:[#allocation2 + $0xb8] sm:$0xff] %vm975_vm4, %v926_v16  ;;  %2992 = vmatmul.mubr.msk.bf16.gmra.mrb[4].mxu1 %vm1340_vm6, %v4052_v33  ;;  %s3267_s5 = scalar_lea.vmem %s4557_s24, 4096  ;;  %p3274_p1 = scmp.lt.s32.totalorder %s4557_s24, %s3272_s7 }
  0xb3   : > { %p3268_p12 = scmp.ne.s32.totalorder %s4557_s24, %s3267_s5  ;;  %p3275_p2 = scmp.lt.s32.totalorder %s3273_s10, %s3267_s5 }
  0xb5   : > { %v1179_v37 = vpop.permute.xlu0 %1178  ;;  %v892_v38 = vpop.permute.xlu1 %891  ;;  %v4058_v44 = vld [vmem:[#allocation2 + $0x20] sm:$0xff]  ;;  %v4060_v23 = vld [vmem:[#allocation2 + $0x28] sm:$0xff]  ;;  %p3269_p13 = pnand %p3268_p12, %p3417_p4  ;;  %p3276_p3 = por %p3275_p2, %p3274_p1 }
  0xb6   : > { %1253 = vst.msk [vmem:[#allocation2 + $0xb0] sm:$0xff] %vm1230_vm5, %v1179_v37  ;;  %2959 = vmatprep.mubr.msk.bf16.mxu0 %vm1340_vm6, %v4058_v44 }
  0xb7   : > { %982 = vst.msk [vmem:[#allocation2 + $0x30] sm:$0xff] %vm975_vm4, %v892_v38  ;;  %2960 = vmatmul.mubr.msk.bf16.gmra.mrb[4].mxu0 %vm1340_vm6, %v4060_v23  ;;  %p3270_p0 = pneg %p3269_p13 }
  0xb9   : > { %v1181_v46 = vpop.permute.xlu0 %1180  ;;  %v894_v40 = vpop.permute.xlu1 %893  ;;  %p3277_p5 = pnand %p3276_p3, %p3270_p0 }
  0xba   : > { %1254 = vst.msk [vmem:[#allocation2 + $0xb8] sm:$0xff] %vm1230_vm5, %v1181_v46 }
  0xbb   : > { %983 = vst.msk [vmem:[#allocation2 + $0x38] sm:$0xff] %vm975_vm4, %v894_v40 }
  0xbd   : > { %v1147_v31 = vpop.permute.xlu0 %1146  ;;  %v1149_v12 = vpop.permute.xlu1 %1148  ;;  %v4070_v19 = vld [vmem:[#allocation2 + $0xb0] sm:$0xff] }
  0xbe   : > { %1237 = vst.msk [vmem:[#allocation2 + $0x30] sm:$0xff] %vm1230_vm5, %v1147_v31  ;;  %1238 = vst.msk [vmem:[#allocation2 + $0x38] sm:$0xff] %vm1230_vm5, %v1149_v12  ;;  %2995 = vmatprep.mubr.msk.bf16.mxu1 %vm1340_vm6, %v4070_v19 }
  0xc1   : > { %v928_v43 = vpop.permute.xlu0 %927  ;;  %v930_v63 = vpop.permute.xlu1 %929  ;;  %v4076_v53 = vld [vmem:[#allocation2 + $0xb8] sm:$0xff] }
  0xc2   : > { %1000 = vst.msk [vmem:[#allocation2 + $0xc0] sm:$0xff] %vm975_vm4, %v928_v43  ;;  %1001 = vst.msk [vmem:[#allocation2 + $0xc8] sm:$0xff] %vm975_vm4, %v930_v63  ;;  %2996 = vmatmul.mubr.msk.bf16.gmra.mrb[8].mxu1 %vm1340_vm6, %v4076_v53 }
  0xc5   : > { %v1183_v20 = vpop.permute.xlu0 %1182  ;;  %v896_v56 = vpop.permute.xlu1 %895  ;;  %v4082_v17 = vld [vmem:[#allocation2 + $0x30] sm:$0xff]  ;;  %v4084_v15 = vld [vmem:[#allocation2 + $0x38] sm:$0xff] }
  0xc6   : > { %1255 = vst.msk [vmem:[#allocation2 + $0xc0] sm:$0xff] %vm1230_vm5, %v1183_v20  ;;  %2963 = vmatprep.mubr.msk.bf16.mxu0 %vm1340_vm6, %v4082_v17 }
  0xc7   : > { %984 = vst.msk [vmem:[#allocation2 + $0x40] sm:$0xff] %vm975_vm4, %v896_v56  ;;  %2964 = vmatmul.mubr.msk.bf16.gmra.mrb[8].mxu0 %vm1340_vm6, %v4084_v15 }
  0xc9   : > { %v1185_v8 = vpop.permute.xlu0 %1184  ;;  %v898_v55 = vpop.permute.xlu1 %897 }
  0xca   : > { %1256 = vst.msk [vmem:[#allocation2 + $0xc8] sm:$0xff] %vm1230_vm5, %v1185_v8 }
  0xcb   : > { %985 = vst.msk [vmem:[#allocation2 + $0x48] sm:$0xff] %vm975_vm4, %v898_v55 }
  0xcd   : > { %v1151_v54 = vpop.permute.xlu0 %1150  ;;  %v1153_v27 = vpop.permute.xlu1 %1152  ;;  %v4094_v41 = vld [vmem:[#allocation2 + $0xc0] sm:$0xff] }
  0xce   : > { %1239 = vst.msk [vmem:[#allocation2 + $0x40] sm:$0xff] %vm1230_vm5, %v1151_v54  ;;  %1240 = vst.msk [vmem:[#allocation2 + $0x48] sm:$0xff] %vm1230_vm5, %v1153_v27  ;;  %2999 = vmatprep.mubr.msk.bf16.mxu1 %vm1340_vm6, %v4094_v41 }
  0xd1   : > { %v932_v32 = vpop.permute.xlu0 %931  ;;  %v934_v61 = vpop.permute.xlu1 %933  ;;  %v4100_v50 = vld [vmem:[#allocation2 + $0xc8] sm:$0xff] }
  0xd2   : > { %1002 = vst.msk [vmem:[#allocation2 + $0xd0] sm:$0xff] %vm975_vm4, %v932_v32  ;;  %1003 = vst.msk [vmem:[#allocation2 + $0xd8] sm:$0xff] %vm975_vm4, %v934_v61  ;;  %3000 = vmatmul.mubr.msk.bf16.gmra.mrb[12].mxu1 %vm1340_vm6, %v4100_v50 }
  0xd5   : > { %v1187_v49 = vpop.permute.xlu0 %1186  ;;  %v900_v29 = vpop.permute.xlu1 %899  ;;  %v4106_v36 = vld [vmem:[#allocation2 + $0x40] sm:$0xff]  ;;  %v4108_v0 = vld [vmem:[#allocation2 + $0x48] sm:$0xff] }
  0xd6   : > { %1257 = vst.msk [vmem:[#allocation2 + $0xd0] sm:$0xff] %vm1230_vm5, %v1187_v49  ;;  %2967 = vmatprep.mubr.msk.bf16.mxu0 %vm1340_vm6, %v4106_v36 }
  0xd7   : > { %986 = vst.msk [vmem:[#allocation2 + $0x50] sm:$0xff] %vm975_vm4, %v900_v29  ;;  %2968 = vmatmul.mubr.msk.bf16.gmra.mrb[12].mxu0 %vm1340_vm6, %v4108_v0 }
  0xd9   : > { %v1189_v25 = vpop.permute.xlu0 %1188  ;;  %v902_v28 = vpop.permute.xlu1 %901 }
  0xda   : > { %1258 = vst.msk [vmem:[#allocation2 + $0xd8] sm:$0xff] %vm1230_vm5, %v1189_v25 }
  0xdb   : > { %987 = vst.msk [vmem:[#allocation2 + $0x58] sm:$0xff] %vm975_vm4, %v902_v28 }
  0xdd   : > { %v1155_v58 = vpop.permute.xlu0 %1154  ;;  %v1157_v6 = vpop.permute.xlu1 %1156  ;;  %v4118_v62 = vld [vmem:[#allocation2 + $0xd0] sm:$0xff] }
  0xde   : > { %1241 = vst.msk [vmem:[#allocation2 + $0x50] sm:$0xff] %vm1230_vm5, %v1155_v58  ;;  %1242 = vst.msk [vmem:[#allocation2 + $0x58] sm:$0xff] %vm1230_vm5, %v1157_v6  ;;  %3003 = vmatprep.mubr.msk.bf16.mxu1 %vm1340_vm6, %v4118_v62 }
  0xe1   : > { %v942_v9 = vpop.permute.xlu0 %941  ;;  %v936_v52 = vpop.permute.xlu1 %935  ;;  %v4130_v45 = vld [vmem:[#allocation2 + $0xd8] sm:$0xff] }
  0xe2   : > { %v1010_v7 = vsel %vm4126_vm7, %v942_v9, %v1009_v34  ;;  %1004 = vst.msk [vmem:[#allocation2 + $0xe0] sm:$0xff] %vm975_vm4, %v936_v52  ;;  %3004 = vmatmul.mubr.msk.bf16.gmra.mrb[16].mxu1 %vm1340_vm6, %v4130_v45 }
  0xe3   : > { %1011 = vst [vmem:[#allocation2 + $0xf8] sm:$0xff] %v1010_v7  ;;  %v1064_v7 = vld [vmem:[#allocation2 + $0x118] sm:$0xff] }
  0xe5   : > { %v938_v10 = vpop.permute.xlu0 %937  ;;  %v1191_v14 = vpop.permute.xlu1 %1190  ;;  %v4137_v35 = vld [vmem:[#allocation2 + $0x50] sm:$0xff]  ;;  %v4139_v39 = vld [vmem:[#allocation2 + $0x58] sm:$0xff] }
  0xe6   : > { %1005 = vst.msk [vmem:[#allocation2 + $0xe8] sm:$0xff] %vm975_vm4, %v938_v10  ;;  %2971 = vmatprep.mubr.msk.bf16.mxu0 %vm1340_vm6, %v4137_v35 }
  0xe7   : > { %1259 = vst.msk [vmem:[#allocation2 + $0xe0] sm:$0xff] %vm1230_vm5, %v1191_v14  ;;  %2972 = vmatmul.mubr.msk.bf16.gmra.mrb[16].mxu0 %vm1340_vm6, %v4139_v39 }
  0xe9   : > { %v904_v22 = vpop.permute.xlu0 %903  ;;  %v1193_v18 = vpop.permute.xlu1 %1192 }
  0xea   : > { %988 = vst.msk [vmem:[#allocation2 + $0x60] sm:$0xff] %vm975_vm4, %v904_v22  ;;  %v1015_v57 = vld [vmem:[#allocation2 + $0xf8] sm:$0x80] }
  0xeb   : > { %1260 = vst.msk [vmem:[#allocation2 + $0xe8] sm:$0xff] %vm1230_vm5, %v1193_v18  ;;  %v1016_v42 = vsel %vm4147_vm10, 0, %v1015_v57 }
  0xec   : > { %1017 = vst [vmem:[#allocation2 + $0xf8] sm:$0x80] %v1016_v42 }
  0xed   : > { %v906_v59 = vpop.permute.xlu0 %905  ;;  %v1159_v2 = vpop.permute.xlu1 %1158  ;;  %1265 = vst.msk [vmem:[#allocation2 + $0xf8] sm:$0x80] %vm1264_vm11, %v3349_v5 }
  0xee   : > { %v4155_v4 = vld [vmem:[#allocation2 + $0xe0] sm:$0xff]  ;;  %989 = vst.msk [vmem:[#allocation2 + $0x68] sm:$0xff] %vm975_vm4, %v906_v59 }
  0xef   : > { %1243 = vst.msk [vmem:[#allocation2 + $0x60] sm:$0xff] %vm1230_vm5, %v1159_v2  ;;  %3007 = vmatprep.mubr.msk.bf16.mxu1 %vm1340_vm6, %v4155_v4 }
  0xf1   : > { %v1161_v11 = vpop.permute.xlu0 %1160  ;;  %v940_v1 = vpop.permute.xlu1 %939 }
  0xf2   : > { %v4163_v30 = vld [vmem:[#allocation2 + $0xe8] sm:$0xff]  ;;  %1244 = vst.msk [vmem:[#allocation2 + $0x68] sm:$0xff] %vm1230_vm5, %v1161_v11 }
  0xf3   : > { %3008 = vmatmul.mubr.msk.bf16.gmra.mrb[20].mxu1 %vm1340_vm6, %v4163_v30  ;;  %1006 = vst.msk [vmem:[#allocation2 + $0xf0] sm:$0xff] %vm975_vm4, %v940_v1 }
  0xf5   : > { %v1195_v47 = vpop.permute.xlu0 %1194  ;;  %v908_v48 = vpop.permute.xlu1 %907 }
  0xf6   : > { %v4169_v16 = vld [vmem:[#allocation2 + $0x60] sm:$0xff]  ;;  %1261 = vst.msk [vmem:[#allocation2 + $0xf0] sm:$0xff] %vm1230_vm5, %v1195_v47 }
  0xf7   : > { %990 = vst.msk [vmem:[#allocation2 + $0x70] sm:$0xff] %vm975_vm4, %v908_v48  ;;  %2975 = vmatprep.mubr.msk.bf16.mxu0 %vm1340_vm6, %v4169_v16 }
  0xf9   : > { %v1197_v37 = vpop.permute.xlu0 %1196  ;;  %v910_v38 = vpop.permute.xlu1 %909  ;;  %v4175_v46 = vld [vmem:[#allocation2 + $0x68] sm:$0xff] }
  0xfa   : > { %1263 = vst.msk [vmem:[#allocation2 + $0xf8] sm:$0x7f] %vm1262_vm12, %v1197_v37  ;;  %2976 = vmatmul.mubr.msk.bf16.gmra.mrb[20].mxu0 %vm1340_vm6, %v4175_v46 }
  0xfb   : > { %991 = vst.msk [vmem:[#allocation2 + $0x78] sm:$0xff] %vm975_vm4, %v910_v38 }
  0xfd   : > { %v1163_v40 = vpop.permute.xlu0 %1162  ;;  %v4181_v31 = vld [vmem:[#allocation2 + $0xf0] sm:$0xff]  ;;  %v1165_v12 = vpop.permute.xlu1 %1164 }
  0xfe   : > { %1245 = vst.msk [vmem:[#allocation2 + $0x70] sm:$0xff] %vm1230_vm5, %v1163_v40  ;;  %3011 = vmatprep.mubr.msk.bf16.mxu1 %vm1340_vm6, %v4181_v31  ;;  %1246 = vst.msk [vmem:[#allocation2 + $0x78] sm:$0xff] %vm1230_vm5, %v1165_v12 }
 0x101   : > { %v1050_v43 = vpop.permute.xlu0 %1049  ;;  %v4187_v63 = vld [vmem:[#allocation2 + $0xf8] sm:$0xff]  ;;  %v1052_v20 = vpop.permute.xlu1 %1051 }
 0x102   : > { %1061 = vst.msk [vmem:[#allocation2 + $0x100] sm:$0xff] %vm975_vm4, %v1050_v43  ;;  %3012 = vmatmul.mubr.msk.bf16.gmra.mrb[24].mxu1 %vm1340_vm6, %v4187_v63  ;;  %1062 = vst.msk [vmem:[#allocation2 + $0x108] sm:$0xff] %vm975_vm4, %v1052_v20 }
 0x105   : > { %v1274_v56 = vpop.permute.xlu0 %1273  ;;  %v912_v8 = vpop.permute.xlu1 %911  ;;  %v4193_v55 = vld [vmem:[#allocation2 + $0x70] sm:$0xff]  ;;  %v4195_v54 = vld [vmem:[#allocation2 + $0x78] sm:$0xff] }
 0x106   : > { %1285 = vst.msk [vmem:[#allocation2 + $0x100] sm:$0xff] %vm1230_vm5, %v1274_v56  ;;  %2979 = vmatprep.mubr.msk.bf16.mxu0 %vm1340_vm6, %v4193_v55 }
 0x107   : > { %992 = vst.msk [vmem:[#allocation2 + $0x80] sm:$0xff] %vm975_vm4, %v912_v8  ;;  %2980 = vmatmul.mubr.msk.bf16.gmra.mrb[24].mxu0 %vm1340_vm6, %v4195_v54 }
 0x109   : > { %v1276_v27 = vpop.permute.xlu0 %1275  ;;  %v914_v32 = vpop.permute.xlu1 %913 }
 0x10a   : > { %1286 = vst.msk [vmem:[#allocation2 + $0x108] sm:$0xff] %vm1230_vm5, %v1276_v27 }
 0x10b   : > { %993 = vst.msk [vmem:[#allocation2 + $0x88] sm:$0xff] %vm975_vm4, %v914_v32 }
 0x10d   : > { %v1167_v61 = vpop.permute.xlu0 %1166  ;;  %v4205_v49 = vld [vmem:[#allocation2 + $0x100] sm:$0xff]  ;;  %v1169_v29 = vpop.permute.xlu1 %1168 }
 0x10e   : > { %1247 = vst.msk [vmem:[#allocation2 + $0x80] sm:$0xff] %vm1230_vm5, %v1167_v61  ;;  %3015 = vmatprep.mubr.msk.bf16.mxu1 %vm1340_vm6, %v4205_v49  ;;  %1248 = vst.msk [vmem:[#allocation2 + $0x88] sm:$0xff] %vm1230_vm5, %v1169_v29 }
 0x111   : > { %v880_v25 = vpop.permute.xlu0 %879  ;;  %v4211_v28 = vld [vmem:[#allocation2 + $0x108] sm:$0xff]  ;;  %v882_v58 = vpop.permute.xlu1 %881 }
 0x112   : > { %976 = vst.msk [vmem:[#allocation2] sm:$0xff] %vm975_vm4, %v880_v25  ;;  %3016 = vmatmul.mubr.msk.bf16.gmra.mrb[28].mxu1 %vm1340_vm6, %v4211_v28  ;;  %977 = vst.msk [vmem:[#allocation2 + $0x8] sm:$0xff] %vm975_vm4, %v882_v58 }
 0x115   : > { %v1306_v6 = vld [vmem:[#allocation2 + $0x80] sm:$0xff]  ;;  %v1307_v34 = vld [vmem:[#allocation2 + $0x88] sm:$0xff]  ;;  %v1135_v9 = vpop.permute.xlu0 %1134 }
 0x116   : > { %2983 = vmatprep.mubr.msk.bf16.mxu0 %vm1340_vm6, %v1306_v6  ;;  %v1137_v52 = vpop.permute.xlu1 %1136  ;;  %1231 = vst.msk [vmem:[#allocation2] sm:$0xff] %vm1230_vm5, %v1135_v9 }
 0x117   : > { %1232 = vst.msk [vmem:[#allocation2 + $0x8] sm:$0xff] %vm1230_vm5, %v1137_v52  ;;  %2984 = vmatmul.mubr.msk.bf16.gmra.mrb[28].mxu0 %vm1340_vm6, %v1307_v34 }
 0x118   : > { %3091 = vmatprep.mubr.msk.bf16.mxu0 %vm1340_vm6, %v4058_v44 }
 0x119   : > { %v1056_v10 = vpop.permute.xlu0 %1055 }
 0x11a   : > { %v1065_v22 = vsel %vm4126_vm7, %v1056_v10, %v1064_v7 }
 0x11b   : > { %1066 = vst [vmem:[#allocation2 + $0x118] sm:$0xff] %v1065_v22 }
 0x11c   : > { %v1054_v14 = vpop.permute.xlu1 %1053 }
 0x11d   : > { %1063 = vst.msk [vmem:[#allocation2 + $0x110] sm:$0xff] %vm975_vm4, %v1054_v14  ;;  %v1290_v18 = vld [vmem:[#allocation2] sm:$0xff]  ;;  %v1278_v42 = vpop.permute.xlu0 %1277 }
 0x11e   : > { %v1291_v57 = vld [vmem:[#allocation2 + $0x8] sm:$0xff]  ;;  %3023 = vmatprep.mubr.msk.bf16.mxu1 %vm1340_vm6, %v1290_v18  ;;  %1287 = vst.msk [vmem:[#allocation2 + $0x110] sm:$0xff] %vm1230_vm5, %v1278_v42 }
 0x11f   : > { %3092 = vmatmul.mubr.msk.bf16.vlgmr.msra.gmra.mrb[32].mxu0 %vm1340_vm6, %v4060_v23  ;;  %3024 = vmatmul.mubr.msk.bf16.vlgmr.msra.gmra.mrb[32].mxu1 %vm1340_vm6, %v1291_v57 }
 0x120   : > { %3095 = vmatprep.mubr.msk.bf16.mxu0 %vm1340_vm6, %v4082_v17  ;;  %3027 = vmatprep.mubr.msk.bf16.mxu1 %vm1340_vm6, %v4000_v26  ;;  %v1280_v13 = vpop.permute.xlu1 %1279 }
 0x121   : > { %1288 = vst.msk [vmem:[#allocation2 + $0x118] sm:$0x7f] %vm1262_vm12, %v1280_v13 }
 0x122   : > { %v1067_v59 = vld [vmem:[#allocation2 + $0x118] sm:$0x80] }
 0x123   : > { %v1068_v2 = vsel %vm4147_vm10, 0, %v1067_v59 }
 0x124   : > { %1069 = vst [vmem:[#allocation2 + $0x118] sm:$0x80] %v1068_v2 }
 0x125   : > { %1289 = vst.msk [vmem:[#allocation2 + $0x118] sm:$0x80] %vm1264_vm11, %v3349_v5 }
 0x127   : > { %3096 = vmatmul.mubr.msk.bf16.gmra.mrb[36].mxu0 %vm1340_vm6, %v4084_v15  ;;  %3028 = vmatmul.mubr.msk.bf16.gmra.mrb[36].mxu1 %vm1340_vm6, %v4021_v51 }
 0x128   : > { %3099 = vmatprep.mubr.msk.bf16.mxu0 %vm1340_vm6, %v4106_v36  ;;  %3031 = vmatprep.mubr.msk.bf16.mxu1 %vm1340_vm6, %v4058_v44 }
 0x12f   : > { %3100 = vmatmul.mubr.msk.bf16.gmra.mrb[40].mxu0 %vm1340_vm6, %v4108_v0  ;;  %3032 = vmatmul.mubr.msk.bf16.gmra.mrb[40].mxu1 %vm1340_vm6, %v4060_v23 }
 0x130   : > { %3103 = vmatprep.mubr.msk.bf16.mxu0 %vm1340_vm6, %v4137_v35  ;;  %3035 = vmatprep.mubr.msk.bf16.mxu1 %vm1340_vm6, %v4082_v17 }
 0x137   : > { %3104 = vmatmul.mubr.msk.bf16.gmra.mrb[44].mxu0 %vm1340_vm6, %v4139_v39  ;;  %3036 = vmatmul.mubr.msk.bf16.gmra.mrb[44].mxu1 %vm1340_vm6, %v4084_v15 }
 0x138   : > { %3107 = vmatprep.mubr.msk.bf16.mxu0 %vm1340_vm6, %v4169_v16  ;;  %3039 = vmatprep.mubr.msk.bf16.mxu1 %vm1340_vm6, %v4106_v36 }
 0x13f   : > { %3108 = vmatmul.mubr.msk.bf16.gmra.mrb[48].mxu0 %vm1340_vm6, %v4175_v46  ;;  %3040 = vmatmul.mubr.msk.bf16.gmra.mrb[48].mxu1 %vm1340_vm6, %v4108_v0 }
 0x140   : > { %3111 = vmatprep.mubr.msk.bf16.mxu0 %vm1340_vm6, %v4193_v55  ;;  %3043 = vmatprep.mubr.msk.bf16.mxu1 %vm1340_vm6, %v4137_v35 }
 0x147   : > { %3112 = vmatmul.mubr.msk.bf16.gmra.mrb[52].mxu0 %vm1340_vm6, %v4195_v54  ;;  %3044 = vmatmul.mubr.msk.bf16.gmra.mrb[52].mxu1 %vm1340_vm6, %v4139_v39 }
 0x148   : > { %3115 = vmatprep.mubr.msk.bf16.mxu0 %vm1340_vm6, %v1306_v6  ;;  %3047 = vmatprep.mubr.msk.bf16.mxu1 %vm1340_vm6, %v4169_v16 }
 0x14f   : > { %3116 = vmatmul.mubr.msk.bf16.gmra.mrb[56].mxu0 %vm1340_vm6, %v1307_v34  ;;  %3048 = vmatmul.mubr.msk.bf16.gmra.mrb[56].mxu1 %vm1340_vm6, %v4175_v46 }
 0x150   : > { %3119 = vmatprep.mubr.msk.bf16.mxu0 %vm1340_vm6, %v4002_v3  ;;  %3051 = vmatprep.mubr.msk.bf16.mxu1 %vm1340_vm6, %v4193_v55 }
 0x157   : > { %3120 = vmatmul.mubr.msk.bf16.gmra.mrb[60].mxu0 %vm1340_vm6, %v4023_v60  ;;  %3052 = vmatmul.mubr.msk.bf16.gmra.mrb[60].mxu1 %vm1340_vm6, %v4195_v54 }
 0x158   : > { %3123 = vmatprep.mubr.msk.bf16.mxu0 %vm1340_vm6, %v4044_v24  ;;  %3055 = vmatprep.mubr.msk.bf16.mxu1 %vm1340_vm6, %v1306_v6 }
 0x15f   : > { %3124 = vmatmul.mubr.msk.bf16.gmra.mrb[64].mxu0 %vm1340_vm6, %v4052_v33  ;;  %3056 = vmatmul.mubr.msk.bf16.gmra.mrb[64].mxu1 %vm1340_vm6, %v1307_v34 }
 0x160   : > { %3127 = vmatprep.mubr.msk.bf16.mxu0 %vm1340_vm6, %v4070_v19  ;;  %3059 = vmatprep.mubr.msk.bf16.mxu1 %vm1340_vm6, %v4002_v3 }
 0x167   : > { %3128 = vmatmul.mubr.msk.bf16.gmra.mrb[68].mxu0 %vm1340_vm6, %v4076_v53  ;;  %3060 = vmatmul.mubr.msk.bf16.gmra.mrb[68].mxu1 %vm1340_vm6, %v4023_v60 }
 0x168   : > { %3131 = vmatprep.mubr.msk.bf16.mxu0 %vm1340_vm6, %v4094_v41  ;;  %3063 = vmatprep.mubr.msk.bf16.mxu1 %vm1340_vm6, %v4044_v24 }
 0x16f   : > { %3132 = vmatmul.mubr.msk.bf16.gmra.mrb[72].mxu0 %vm1340_vm6, %v4100_v50  ;;  %3064 = vmatmul.mubr.msk.bf16.gmra.mrb[72].mxu1 %vm1340_vm6, %v4052_v33 }
 0x170   : > { %3135 = vmatprep.mubr.msk.bf16.mxu0 %vm1340_vm6, %v4118_v62  ;;  %3067 = vmatprep.mubr.msk.bf16.mxu1 %vm1340_vm6, %v4070_v19 }
 0x177   : > { %3136 = vmatmul.mubr.msk.bf16.gmra.mrb[76].mxu0 %vm1340_vm6, %v4130_v45  ;;  %3068 = vmatmul.mubr.msk.bf16.gmra.mrb[76].mxu1 %vm1340_vm6, %v4076_v53 }
 0x178   : > { %3139 = vmatprep.mubr.msk.bf16.mxu0 %vm1340_vm6, %v4155_v4  ;;  %3071 = vmatprep.mubr.msk.bf16.mxu1 %vm1340_vm6, %v4094_v41 }
 0x17a   : > { %v2957_v26 = vpop.f32.mrb[0].mxu0 }
 0x17b   : > { %v2989_v3 = vpop.f32.mrb[0].mxu1  ;;  %v4324_v51 = vpop.f32.mrb[1].mxu0 }
 0x17c   : > { %v4326_v60 = vpop.f32.mrb[1].mxu1  ;;  %v2958_v24 = vpop.f32.mrb[2].mxu0 }
 0x17d   : > { %v2990_v33 = vpop.f32.mrb[2].mxu1  ;;  %v4328_v44 = vpop.f32.mrb[3].mxu0 }
 0x17e   : > { %v4330_v23 = vpop.f32.mrb[3].mxu1 }
 0x17f   : > { %3140 = vmatmul.mubr.msk.bf16.gmra.mrb[80].mxu0 %vm1340_vm6, %v4163_v30  ;;  %3072 = vmatmul.mubr.msk.bf16.gmra.mrb[80].mxu1 %vm1340_vm6, %v4100_v50 }
 0x180   : > { %3143 = vmatprep.mubr.msk.bf16.mxu0 %vm1340_vm6, %v4181_v31  ;;  %3075 = vmatprep.mubr.msk.bf16.mxu1 %vm1340_vm6, %v4118_v62  ;;  %v2003_v62 = vld [vmem:[#allocation2 + $0x110] sm:$0xff] }
 0x185   : > { %v2993_v19 = vpop.f32.mrb[4].mxu1 }
 0x186   : > { %v4340_v53 = vpop.f32.mrb[5].mxu1 }
 0x187   : > { %v2994_v17 = vpop.f32.mrb[6].mxu1  ;;  %3144 = vmatmul.mubr.msk.bf16.gmra.mrb[84].mxu0 %vm1340_vm6, %v4187_v63  ;;  %3076 = vmatmul.mubr.msk.bf16.gmra.mrb[84].mxu1 %vm1340_vm6, %v4130_v45  ;;  %v2004_v45 = vld [vmem:[#allocation2 + $0x118] sm:$0xff] }
 0x188   : > { %v4346_v15 = vpop.f32.mrb[7].mxu1  ;;  %3147 = vmatprep.mubr.msk.bf16.mxu0 %vm1340_vm6, %v4205_v49  ;;  %3079 = vmatprep.mubr.msk.bf16.mxu1 %vm1340_vm6, %v4155_v4 }
 0x18a   : > { %v2961_v41 = vpop.f32.mrb[4].mxu0 }
 0x18b   : > { %v4352_v50 = vpop.f32.mrb[5].mxu0 }
 0x18c   : > { %v2962_v36 = vpop.f32.mrb[6].mxu0 }
 0x18d   : > { %v4354_v0 = vpop.f32.mrb[7].mxu0 }
 0x18f   : > { %3148 = vmatmul.mubr.msk.bf16.gmra.mrb[88].mxu0 %vm1340_vm6, %v4211_v28  ;;  %3080 = vmatmul.mubr.msk.bf16.gmra.mrb[88].mxu1 %vm1340_vm6, %v4163_v30 }
 0x190   : > { %3151 = vmatprep.mubr.msk.bf16.mxu0 %vm1340_vm6, %v2003_v62  ;;  %3083 = vmatprep.mubr.msk.bf16.mxu1 %vm1340_vm6, %v4181_v31 }
 0x195   : > { %v2997_v35 = vpop.f32.mrb[8].mxu1 }
 0x196   : > { %v4363_v39 = vpop.f32.mrb[9].mxu1  ;;  %v4419_v35 = vld [vmem:[%s4613_s3] ss:$0 sm:$0xff] }
 0x197   : > { %v2998_v21 = vpop.f32.mrb[10].mxu1  ;;  %3152 = vmatmul.mubr.msk.bf16.gmra.mrb[92].mxu0 %vm1340_vm6, %v2004_v45  ;;  %3084 = vmatmul.mubr.msk.bf16.gmra.mrb[92].mxu1 %vm1340_vm6, %v4187_v63 }
 0x198   : > { %v4368_v4 = vpop.f32.mrb[11].mxu1 }
 0x19a   : > { %v2965_v5 = vpop.f32.mrb[8].mxu0 }
 0x19b   : > { %v4370_v11 = vpop.f32.mrb[9].mxu0 }
 0x19c   : > { %v2966_v30 = vpop.f32.mrb[10].mxu0 }
 0x19d   : > { %v4372_v1 = vpop.f32.mrb[11].mxu0 }
 0x1a5   : > { %v3001_v47 = vpop.f32.mrb[12].mxu1 }
 0x1a6   : > { %v4374_v48 = vpop.f32.mrb[13].mxu1 }
 0x1a7   : > { %v3002_v16 = vpop.f32.mrb[14].mxu1 }
 0x1a8   : > { %v4376_v37 = vpop.f32.mrb[15].mxu1 }
 0x1aa   : > { %v2969_v38 = vpop.f32.mrb[12].mxu0 }
 0x1ab   : > { %v4378_v46 = vpop.f32.mrb[13].mxu0 }
 0x1ac   : > { %v2970_v40 = vpop.f32.mrb[14].mxu0 }
 0x1ad   : > { %v4380_v31 = vpop.f32.mrb[15].mxu0 }
 0x1b5   : > { %v3005_v12 = vpop.f32.mrb[16].mxu1 }
 0x1b6   : > { %v4382_v43 = vpop.f32.mrb[17].mxu1 }
 0x1b7   : > { %v3006_v63 = vpop.f32.mrb[18].mxu1 }
 0x1b8   : > { %v4384_v20 = vpop.f32.mrb[19].mxu1 }
 0x1ba   : > { %v2973_v56 = vpop.f32.mrb[16].mxu0 }
 0x1bb   : > { %v4386_v8 = vpop.f32.mrb[17].mxu0 }
 0x1bc   : > { %v2974_v55 = vpop.f32.mrb[18].mxu0 }
 0x1bd   : > { %v4388_v54 = vpop.f32.mrb[19].mxu0 }
 0x1c6   : > { %v3009_v27 = vpop.f32.mrb[20].mxu1 }
 0x1c7   : > { %v4390_v32 = vpop.f32.mrb[21].mxu1 }
 0x1c8   : > { %v3010_v61 = vpop.f32.mrb[22].mxu1 }
 0x1c9   : > { %v4392_v49 = vpop.f32.mrb[23].mxu1 }
 0x1cd   : > { %v2977_v29 = vpop.f32.mrb[20].mxu0 }
 0x1ce   : > { %v4394_v25 = vpop.f32.mrb[21].mxu0 }
 0x1cf   : > { %v2978_v28 = vpop.f32.mrb[22].mxu0 }
 0x1d0   : > { %v4396_v58 = vpop.f32.mrb[23].mxu0 }
 0x1d5   : > { %v3013_v6 = vpop.f32.mrb[24].mxu1 }
 0x1d6   : > { %v4398_v34 = vpop.f32.mrb[25].mxu1 }
 0x1d7   : > { %v3014_v9 = vpop.f32.mrb[26].mxu1 }
 0x1d8   : > { %v4400_v52 = vpop.f32.mrb[27].mxu1 }
 0x1da   : > { %v2981_v7 = vpop.f32.mrb[24].mxu0 }
 0x1db   : > { %v4402_v10 = vpop.f32.mrb[25].mxu0 }
 0x1dc   : > { %v2982_v14 = vpop.f32.mrb[26].mxu0 }
 0x1dd   : > { %v4404_v22 = vpop.f32.mrb[27].mxu0 }
 0x1e5   : > { %v3017_v18 = vpop.f32.mrb[28].mxu1 }
 0x1e6   : > { %v4406_v57 = vpop.f32.mrb[29].mxu1 }
 0x1e7   : > { %v3018_v42 = vpop.f32.mrb[30].mxu1 }
 0x1e8   : > { %v4408_v13 = vpop.f32.mrb[31].mxu1 }
 0x1ea   : > { %v2985_v59 = vpop.f32.mrb[28].mxu0 }
 0x1eb   : > { %v4410_v2 = vpop.f32.mrb[29].mxu0 }
 0x1ec   : > { %v2986_v26 = vpop.f32.mrb[30].mxu0 }
 0x1ed   : > { %v4412_v3 = vpop.f32.mrb[31].mxu0 }
 0x1f2   : > { %v3093_v24 = vpop.f32.mrb[32].mxu0  ;;  %v3025_v33 = vpop.f32.mrb[32].mxu1 }
 0x1f3   : > { %v2151_v19 = vpop.f32.mrb[33].mxu0  ;;  %v1750_v17 = vpop.f32.mrb[33].mxu1 }
 0x1f4   : > { %v3094_v41 = vpop.f32.mrb[34].mxu0  ;;  %v1751_v36 = vadd.f32 %v1750_v17, %v4324_v51  ;;  %v3026_v62 = vpop.f32.mrb[34].mxu1 }
 0x1f5   : > { %v2154_v45 = vpop.f32.mrb[35].mxu0  ;;  %v1753_v21 = vpop.f32.mrb[35].mxu1 }
 0x1f6   : > { %v2374_v5 = vadd.f32 %v2151_v19, %v1751_v36  ;;  %v1754_v30 = vadd.f32 %v1753_v21, %v4328_v44 }
 0x1f8   : > { %v2413_v47 = vadd.f32 %v4419_v35, %v2374_v5  ;;  %v2375_v16 = vadd.f32 %v2154_v45, %v1754_v30 }
 0x1fa   : > { %v3097_v38 = vpop.f32.mrb[36].mxu0  ;;  %vm2445_vm13 = vcmp.ge.f32.partialorder %v2413_v47, 0.0  ;;  %v2477_v40 = vmul.f32 0.01, %v2413_v47  ;;  %v2414_v51 = vadd.f32 %v4419_v35, %v2375_v16  ;;  %v3029_v12 = vpop.f32.mrb[36].mxu1 }
 0x1fb   : > { %v2165_v63 = vpop.f32.mrb[37].mxu0  ;;  %v1764_v56 = vpop.f32.mrb[37].mxu1 }
 0x1fc   : > { %v3098_v55 = vpop.f32.mrb[38].mxu0  ;;  %v2509_v27 = vsel %vm2445_vm13, %v2413_v47, %v2477_v40  ;;  %vm2446_vm15 = vcmp.ge.f32.partialorder %v2414_v51, 0.0  ;;  %v2478_v61 = vmul.f32 0.01, %v2414_v51  ;;  %v1765_v29 = vadd.f32 %v1764_v56, %v4352_v50  ;;  %v3030_v28 = vpop.f32.mrb[38].mxu1 }
 0x1fd   : > { %v2168_v44 = vpop.f32.mrb[39].mxu0  ;;  %2542 = vst.msk [vmem:[%s4427_s21] sm:$0xff] %vm2541_vm14, %v2509_v27  ;;  %v1767_v6 = vpop.f32.mrb[39].mxu1 }
 0x1fe   : > { %v2510_v9 = vsel %vm2446_vm15, %v2414_v51, %v2478_v61  ;;  %v2376_v7 = vadd.f32 %v2165_v63, %v1765_v29  ;;  %v1768_v14 = vadd.f32 %v1767_v6, %v4354_v0 }
 0x1ff   : > { %2543 = vst.msk [vmem:[%s4427_s21 + $0x8] sm:$0xff] %vm2541_vm14, %v2510_v9 }
 0x200   : > { %v2415_v18 = vadd.f32 %v4419_v35, %v2376_v7  ;;  %v2377_v42 = vadd.f32 %v2168_v44, %v1768_v14 }
 0x202   : > { %v3101_v50 = vpop.f32.mrb[40].mxu0  ;;  %vm2447_vm0 = vcmp.ge.f32.partialorder %v2415_v18, 0.0  ;;  %v2479_v59 = vmul.f32 0.01, %v2415_v18  ;;  %v2416_v26 = vadd.f32 %v4419_v35, %v2377_v42  ;;  %v3033_v24 = vpop.f32.mrb[40].mxu1 }
 0x203   : > { %v2179_v33 = vpop.f32.mrb[41].mxu0  ;;  %v1778_v19 = vpop.f32.mrb[41].mxu1 }
 0x204   : > { %v3102_v17 = vpop.f32.mrb[42].mxu0  ;;  %v2511_v41 = vsel %vm2447_vm0, %v2415_v18, %v2479_v59  ;;  %vm2448_vm1 = vcmp.ge.f32.partialorder %v2416_v26, 0.0  ;;  %v2480_v36 = vmul.f32 0.01, %v2416_v26  ;;  %v1779_v0 = vadd.f32 %v1778_v19, %v4370_v11  ;;  %v3034_v62 = vpop.f32.mrb[42].mxu1 }
 0x205   : > { %v2182_v45 = vpop.f32.mrb[43].mxu0  ;;  %2544 = vst.msk [vmem:[%s4427_s21 + $0x10] sm:$0xff] %vm2541_vm14, %v2511_v41  ;;  %v1781_v21 = vpop.f32.mrb[43].mxu1 }
 0x206   : > { %v2512_v5 = vsel %vm2448_vm1, %v2416_v26, %v2480_v36  ;;  %v2378_v30 = vadd.f32 %v2179_v33, %v1779_v0  ;;  %v1782_v47 = vadd.f32 %v1781_v21, %v4372_v1 }
 0x207   : > { %2545 = vst.msk [vmem:[%s4427_s21 + $0x18] sm:$0xff] %vm2541_vm14, %v2512_v5 }
 0x208   : > { %v2417_v16 = vadd.f32 %v4419_v35, %v2378_v30  ;;  %v2379_v38 = vadd.f32 %v2182_v45, %v1782_v47 }
 0x20a   : > { %v3105_v40 = vpop.f32.mrb[44].mxu0  ;;  %vm2449_vm2 = vcmp.ge.f32.partialorder %v2417_v16, 0.0  ;;  %v2481_v51 = vmul.f32 0.01, %v2417_v16  ;;  %v2418_v11 = vadd.f32 %v4419_v35, %v2379_v38  ;;  %v3037_v12 = vpop.f32.mrb[44].mxu1 }
 0x20b   : > { %v2193_v63 = vpop.f32.mrb[45].mxu0  ;;  %v1792_v56 = vpop.f32.mrb[45].mxu1 }
 0x20c   : > { %v3106_v55 = vpop.f32.mrb[46].mxu0  ;;  %v2513_v27 = vsel %vm2449_vm2, %v2417_v16, %v2481_v51  ;;  %vm2450_vm3 = vcmp.ge.f32.partialorder %v2418_v11, 0.0  ;;  %v2482_v61 = vmul.f32 0.01, %v2418_v11  ;;  %v1793_v1 = vadd.f32 %v1792_v56, %v4378_v46  ;;  %v3038_v29 = vpop.f32.mrb[46].mxu1 }
 0x20d   : > { %v2196_v28 = vpop.f32.mrb[47].mxu0  ;;  %2546 = vst.msk [vmem:[%s4427_s21 + $0x20] sm:$0xff] %vm2541_vm14, %v2513_v27  ;;  %v1795_v44 = vpop.f32.mrb[47].mxu1 }
 0x20e   : > { %v2514_v6 = vsel %vm2450_vm3, %v2418_v11, %v2482_v61  ;;  %v2380_v9 = vadd.f32 %v2193_v63, %v1793_v1  ;;  %v1796_v7 = vadd.f32 %v1795_v44, %v4380_v31 }
 0x20f   : > { %2547 = vst.msk [vmem:[%s4427_s21 + $0x28] sm:$0xff] %vm2541_vm14, %v2514_v6 }
 0x210   : > { %v2419_v14 = vadd.f32 %v4419_v35, %v2380_v9  ;;  %v2381_v18 = vadd.f32 %v2196_v28, %v1796_v7 }
 0x212   : > { %v3109_v42 = vpop.f32.mrb[48].mxu0  ;;  %vm2451_vm4 = vcmp.ge.f32.partialorder %v2419_v14, 0.0  ;;  %v2483_v50 = vmul.f32 0.01, %v2419_v14  ;;  %v2420_v46 = vadd.f32 %v4419_v35, %v2381_v18  ;;  %v3041_v59 = vpop.f32.mrb[48].mxu1 }
 0x213   : > { %v2207_v26 = vpop.f32.mrb[49].mxu0  ;;  %v1806_v24 = vpop.f32.mrb[49].mxu1 }
 0x214   : > { %v3110_v33 = vpop.f32.mrb[50].mxu0  ;;  %v2515_v19 = vsel %vm2451_vm4, %v2419_v14, %v2483_v50  ;;  %vm2452_vm5 = vcmp.ge.f32.partialorder %v2420_v46, 0.0  ;;  %v2484_v17 = vmul.f32 0.01, %v2420_v46  ;;  %v1807_v31 = vadd.f32 %v1806_v24, %v4386_v8  ;;  %v3042_v41 = vpop.f32.mrb[50].mxu1 }
 0x215   : > { %v2210_v36 = vpop.f32.mrb[51].mxu0  ;;  %2548 = vst.msk [vmem:[%s4427_s21 + $0x30] sm:$0xff] %vm2541_vm14, %v2515_v19  ;;  %v1809_v0 = vpop.f32.mrb[51].mxu1 }
 0x216   : > { %v2516_v62 = vsel %vm2452_vm5, %v2420_v46, %v2484_v17  ;;  %v2382_v45 = vadd.f32 %v2207_v26, %v1807_v31  ;;  %v1810_v21 = vadd.f32 %v1809_v0, %v4388_v54 }
 0x217   : > { %2549 = vst.msk [vmem:[%s4427_s21 + $0x38] sm:$0xff] %vm2541_vm14, %v2516_v62 }
 0x218   : > { %v2421_v5 = vadd.f32 %v4419_v35, %v2382_v45  ;;  %v2383_v30 = vadd.f32 %v2210_v36, %v1810_v21 }
 0x21a   : > { %v3113_v47 = vpop.f32.mrb[52].mxu0  ;;  %vm2453_vm6 = vcmp.ge.f32.partialorder %v2421_v5, 0.0  ;;  %v2485_v16 = vmul.f32 0.01, %v2421_v5  ;;  %v2422_v8 = vadd.f32 %v4419_v35, %v2383_v30  ;;  %v3045_v38 = vpop.f32.mrb[52].mxu1 }
 0x21b   : > { %v2221_v40 = vpop.f32.mrb[53].mxu0  ;;  %v1820_v51 = vpop.f32.mrb[53].mxu1 }
 0x21c   : > { %v3114_v11 = vpop.f32.mrb[54].mxu0  ;;  %v2517_v12 = vsel %vm2453_vm6, %v2421_v5, %v2485_v16  ;;  %vm2454_vm7 = vcmp.ge.f32.partialorder %v2422_v8, 0.0  ;;  %v2486_v63 = vmul.f32 0.01, %v2422_v8  ;;  %v1821_v54 = vadd.f32 %v1820_v51, %v4394_v25  ;;  %v3046_v56 = vpop.f32.mrb[54].mxu1 }
 0x21d   : > { %v2224_v55 = vpop.f32.mrb[55].mxu0  ;;  %2550 = vst.msk [vmem:[%s4427_s21 + $0x40] sm:$0xff] %vm2541_vm14, %v2517_v12  ;;  %v1823_v27 = vpop.f32.mrb[55].mxu1 }
 0x21e   : > { %v2518_v61 = vsel %vm2454_vm7, %v2422_v8, %v2486_v63  ;;  %v2384_v1 = vadd.f32 %v2221_v40, %v1821_v54  ;;  %v1824_v29 = vadd.f32 %v1823_v27, %v4396_v58 }
 0x21f   : > { %2551 = vst.msk [vmem:[%s4427_s21 + $0x48] sm:$0xff] %vm2541_vm14, %v2518_v61 }
 0x220   : > { %v2423_v28 = vadd.f32 %v4419_v35, %v2384_v1  ;;  %v2385_v44 = vadd.f32 %v2224_v55, %v1824_v29 }
 0x222   : > { %v3117_v6 = vpop.f32.mrb[56].mxu0  ;;  %vm2455_vm8 = vcmp.ge.f32.partialorder %v2423_v28, 0.0  ;;  %v2487_v9 = vmul.f32 0.01, %v2423_v28  ;;  %v2424_v25 = vadd.f32 %v4419_v35, %v2385_v44  ;;  %v3049_v7 = vpop.f32.mrb[56].mxu1 }
 0x223   : > { %v2235_v14 = vpop.f32.mrb[57].mxu0  ;;  %v1834_v18 = vpop.f32.mrb[57].mxu1 }
 0x224   : > { %v3118_v42 = vpop.f32.mrb[58].mxu0  ;;  %v2519_v50 = vsel %vm2455_vm8, %v2423_v28, %v2487_v9  ;;  %vm2456_vm9 = vcmp.ge.f32.partialorder %v2424_v25, 0.0  ;;  %v2488_v46 = vmul.f32 0.01, %v2424_v25  ;;  %v1835_v58 = vadd.f32 %v1834_v18, %v4402_v10  ;;  %v3050_v59 = vpop.f32.mrb[58].mxu1 }
 0x225   : > { %v2238_v26 = vpop.f32.mrb[59].mxu0  ;;  %2552 = vst.msk [vmem:[%s4427_s21 + $0x50] sm:$0xff] %vm2541_vm14, %v2519_v50  ;;  %v1837_v24 = vpop.f32.mrb[59].mxu1 }
 0x226   : > { %v2520_v33 = vsel %vm2456_vm9, %v2424_v25, %v2488_v46  ;;  %v2386_v19 = vadd.f32 %v2235_v14, %v1835_v58  ;;  %v1838_v17 = vadd.f32 %v1837_v24, %v4404_v22 }
 0x227   : > { %2553 = vst.msk [vmem:[%s4427_s21 + $0x58] sm:$0xff] %vm2541_vm14, %v2520_v33 }
 0x228   : > { %v2425_v31 = vadd.f32 %v4419_v35, %v2386_v19  ;;  %v2387_v41 = vadd.f32 %v2238_v26, %v1838_v17 }
 0x22a   : > { %v3121_v36 = vpop.f32.mrb[60].mxu0  ;;  %vm2457_vm10 = vcmp.ge.f32.partialorder %v2425_v31, 0.0  ;;  %v2489_v0 = vmul.f32 0.01, %v2425_v31  ;;  %v2426_v10 = vadd.f32 %v4419_v35, %v2387_v41  ;;  %v3053_v62 = vpop.f32.mrb[60].mxu1 }
 0x22b   : > { %v2249_v45 = vpop.f32.mrb[61].mxu0  ;;  %v1848_v21 = vpop.f32.mrb[61].mxu1 }
 0x22c   : > { %v3122_v5 = vpop.f32.mrb[62].mxu0  ;;  %v2521_v30 = vsel %vm2457_vm10, %v2425_v31, %v2489_v0  ;;  %vm2458_vm11 = vcmp.ge.f32.partialorder %v2426_v10, 0.0  ;;  %v2490_v47 = vmul.f32 0.01, %v2426_v10  ;;  %v1849_v22 = vadd.f32 %v1848_v21, %v4410_v2  ;;  %v3054_v16 = vpop.f32.mrb[62].mxu1 }
 0x22d   : > { %v2252_v8 = vpop.f32.mrb[63].mxu0  ;;  %2554 = vst.msk [vmem:[%s4427_s21 + $0x60] sm:$0xff] %vm2541_vm14, %v2521_v30  ;;  %v1851_v38 = vpop.f32.mrb[63].mxu1 }
 0x22e   : > { %v2522_v40 = vsel %vm2458_vm11, %v2426_v10, %v2490_v47  ;;  %v2388_v51 = vadd.f32 %v2249_v45, %v1849_v22  ;;  %v1852_v11 = vadd.f32 %v1851_v38, %v4412_v3 }
 0x22f   : > { %2555 = vst.msk [vmem:[%s4427_s21 + $0x68] sm:$0xff] %vm2541_vm14, %v2522_v40 }
 0x230   : > { %v2427_v12 = vadd.f32 %v4419_v35, %v2388_v51  ;;  %v2389_v63 = vadd.f32 %v2252_v8, %v1852_v11 }
 0x232   : > { %v3125_v54 = vpop.f32.mrb[64].mxu0  ;;  %vm2459_vm12 = vcmp.ge.f32.partialorder %v2427_v12, 0.0  ;;  %v2491_v56 = vmul.f32 0.01, %v2427_v12  ;;  %v2428_v2 = vadd.f32 %v4419_v35, %v2389_v63  ;;  %v3057_v55 = vpop.f32.mrb[64].mxu1 }
 0x233   : > { %v2263_v27 = vpop.f32.mrb[65].mxu0  ;;  %v1862_v61 = vpop.f32.mrb[65].mxu1 }
 0x234   : > { %v3126_v1 = vpop.f32.mrb[66].mxu0  ;;  %v2523_v29 = vsel %vm2459_vm12, %v2427_v12, %v2491_v56  ;;  %vm2460_vm13 = vcmp.ge.f32.partialorder %v2428_v2, 0.0  ;;  %v2492_v28 = vmul.f32 0.01, %v2428_v2  ;;  %v1863_v3 = vadd.f32 %v1862_v61, %v4326_v60  ;;  %v3058_v44 = vpop.f32.mrb[66].mxu1 }
 0x235   : > { %v2266_v6 = vpop.f32.mrb[67].mxu0  ;;  %2556 = vst.msk [vmem:[%s4427_s21 + $0x70] sm:$0xff] %vm2541_vm14, %v2523_v29  ;;  %v1865_v9 = vpop.f32.mrb[67].mxu1 }
 0x236   : > { %v2524_v25 = vsel %vm2460_vm13, %v2428_v2, %v2492_v28  ;;  %v2390_v7 = vadd.f32 %v2263_v27, %v1863_v3  ;;  %v1866_v14 = vadd.f32 %v1865_v9, %v4330_v23 }
 0x237   : > { %2557 = vst.msk [vmem:[%s4427_s21 + $0x78] sm:$0xff] %vm2541_vm14, %v2524_v25 }
 0x238   : > { %v2429_v18 = vadd.f32 %v4419_v35, %v2390_v7  ;;  %v2391_v42 = vadd.f32 %v2266_v6, %v1866_v14 }
 0x23a   : > { %v3129_v50 = vpop.f32.mrb[68].mxu0  ;;  %vm2461_vm15 = vcmp.ge.f32.partialorder %v2429_v18, 0.0  ;;  %v2493_v46 = vmul.f32 0.01, %v2429_v18  ;;  %v2430_v60 = vadd.f32 %v4419_v35, %v2391_v42  ;;  %v3061_v58 = vpop.f32.mrb[68].mxu1 }
 0x23b   : > { %v2277_v59 = vpop.f32.mrb[69].mxu0  ;;  %v1876_v26 = vpop.f32.mrb[69].mxu1 }
 0x23c   : > { %v3130_v24 = vpop.f32.mrb[70].mxu0  ;;  %v2525_v33 = vsel %vm2461_vm15, %v2429_v18, %v2493_v46  ;;  %vm2462_vm0 = vcmp.ge.f32.partialorder %v2430_v60, 0.0  ;;  %v2494_v19 = vmul.f32 0.01, %v2430_v60  ;;  %v1877_v23 = vadd.f32 %v1876_v26, %v4340_v53  ;;  %v3062_v17 = vpop.f32.mrb[70].mxu1 }
 0x23d   : > { %v2280_v31 = vpop.f32.mrb[71].mxu0  ;;  %2558 = vst.msk [vmem:[%s4427_s21 + $0x80] sm:$0xff] %vm2541_vm14, %v2525_v33  ;;  %v1879_v41 = vpop.f32.mrb[71].mxu1 }
 0x23e   : > { %v2526_v36 = vsel %vm2462_vm0, %v2430_v60, %v2494_v19  ;;  %v2392_v0 = vadd.f32 %v2277_v59, %v1877_v23  ;;  %v1880_v10 = vadd.f32 %v1879_v41, %v4346_v15 }
 0x23f   : > { %2559 = vst.msk [vmem:[%s4427_s21 + $0x88] sm:$0xff] %vm2541_vm14, %v2526_v36 }
 0x240   : > { %v2431_v62 = vadd.f32 %v4419_v35, %v2392_v0  ;;  %v2393_v45 = vadd.f32 %v2280_v31, %v1880_v10 }
 0x242   : > { %v3133_v21 = vpop.f32.mrb[72].mxu0  ;;  %vm2463_vm1 = vcmp.ge.f32.partialorder %v2431_v62, 0.0  ;;  %v2495_v5 = vmul.f32 0.01, %v2431_v62  ;;  %v2432_v53 = vadd.f32 %v4419_v35, %v2393_v45  ;;  %v3065_v30 = vpop.f32.mrb[72].mxu1 }
 0x243   : > { %v2291_v47 = vpop.f32.mrb[73].mxu0  ;;  %v1890_v22 = vpop.f32.mrb[73].mxu1 }
 0x244   : > { %v3134_v16 = vpop.f32.mrb[74].mxu0  ;;  %v2527_v8 = vsel %vm2463_vm1, %v2431_v62, %v2495_v5  ;;  %vm2464_vm2 = vcmp.ge.f32.partialorder %v2432_v53, 0.0  ;;  %v2496_v38 = vmul.f32 0.01, %v2432_v53  ;;  %v1891_v15 = vadd.f32 %v1890_v22, %v4363_v39  ;;  %v3066_v40 = vpop.f32.mrb[74].mxu1 }
 0x245   : > { %v2294_v51 = vpop.f32.mrb[75].mxu0  ;;  %2560 = vst.msk [vmem:[%s4427_s21 + $0x90] sm:$0xff] %vm2541_vm14, %v2527_v8  ;;  %v1893_v11 = vpop.f32.mrb[75].mxu1 }
 0x246   : > { %v2528_v12 = vsel %vm2464_vm2, %v2432_v53, %v2496_v38  ;;  %v2394_v63 = vadd.f32 %v2291_v47, %v1891_v15  ;;  %v1894_v54 = vadd.f32 %v1893_v11, %v4368_v4 }
 0x247   : > { %2561 = vst.msk [vmem:[%s4427_s21 + $0x98] sm:$0xff] %vm2541_vm14, %v2528_v12 }
 0x248   : > { %v2433_v56 = vadd.f32 %v4419_v35, %v2394_v63  ;;  %v2395_v2 = vadd.f32 %v2294_v51, %v1894_v54 }
 0x24a   : > { %v3137_v55 = vpop.f32.mrb[76].mxu0  ;;  %vm2465_vm3 = vcmp.ge.f32.partialorder %v2433_v56, 0.0  ;;  %v2497_v27 = vmul.f32 0.01, %v2433_v56  ;;  %v2434_v39 = vadd.f32 %v4419_v35, %v2395_v2  ;;  %v3069_v61 = vpop.f32.mrb[76].mxu1 }
 0x24b   : > { %v2305_v1 = vpop.f32.mrb[77].mxu0  ;;  %v1904_v29 = vpop.f32.mrb[77].mxu1 }
 0x24c   : > { %v3138_v28 = vpop.f32.mrb[78].mxu0  ;;  %v2529_v3 = vsel %vm2465_vm3, %v2433_v56, %v2497_v27  ;;  %vm2466_vm4 = vcmp.ge.f32.partialorder %v2434_v39, 0.0  ;;  %v2498_v44 = vmul.f32 0.01, %v2434_v39  ;;  %v1905_v4 = vadd.f32 %v1904_v29, %v4374_v48  ;;  %v3070_v6 = vpop.f32.mrb[78].mxu1 }
 0x24d   : > { %v2308_v9 = vpop.f32.mrb[79].mxu0  ;;  %2562 = vst.msk [vmem:[%s4427_s21 + $0xa0] sm:$0xff] %vm2541_vm14, %v2529_v3  ;;  %v1907_v25 = vpop.f32.mrb[79].mxu1 }
 0x24e   : > { %v2530_v7 = vsel %vm2466_vm4, %v2434_v39, %v2498_v44  ;;  %v2396_v14 = vadd.f32 %v2305_v1, %v1905_v4  ;;  %v1908_v18 = vadd.f32 %v1907_v25, %v4376_v37 }
 0x24f   : > { %2563 = vst.msk [vmem:[%s4427_s21 + $0xa8] sm:$0xff] %vm2541_vm14, %v2530_v7 }
 0x250   : > { %v2435_v42 = vadd.f32 %v4419_v35, %v2396_v14  ;;  %v2397_v50 = vadd.f32 %v2308_v9, %v1908_v18 }
 0x252   : > { %v3141_v46 = vpop.f32.mrb[80].mxu0  ;;  %vm2467_vm5 = vcmp.ge.f32.partialorder %v2435_v42, 0.0  ;;  %v2499_v60 = vmul.f32 0.01, %v2435_v42  ;;  %v2436_v48 = vadd.f32 %v4419_v35, %v2397_v50  ;;  %v3073_v58 = vpop.f32.mrb[80].mxu1 }
 0x253   : > { %v2319_v59 = vpop.f32.mrb[81].mxu0  ;;  %v1918_v26 = vpop.f32.mrb[81].mxu1 }
 0x254   : > { %v3142_v24 = vpop.f32.mrb[82].mxu0  ;;  %v2531_v33 = vsel %vm2467_vm5, %v2435_v42, %v2499_v60  ;;  %vm2468_vm6 = vcmp.ge.f32.partialorder %v2436_v48, 0.0  ;;  %v2500_v19 = vmul.f32 0.01, %v2436_v48  ;;  %v1919_v37 = vadd.f32 %v1918_v26, %v4382_v43  ;;  %v3074_v23 = vpop.f32.mrb[82].mxu1 }
 0x255   : > { %v2322_v17 = vpop.f32.mrb[83].mxu0  ;;  %2564 = vst.msk [vmem:[%s4427_s21 + $0xb0] sm:$0xff] %vm2541_vm14, %v2531_v33  ;;  %v1921_v31 = vpop.f32.mrb[83].mxu1 }
 0x256   : > { %v2532_v41 = vsel %vm2468_vm6, %v2436_v48, %v2500_v19  ;;  %v2398_v36 = vadd.f32 %v2319_v59, %v1919_v37  ;;  %v1922_v0 = vadd.f32 %v1921_v31, %v4384_v20 }
 0x257   : > { %2565 = vst.msk [vmem:[%s4427_s21 + $0xb8] sm:$0xff] %vm2541_vm14, %v2532_v41 }
 0x258   : > { %v2437_v10 = vadd.f32 %v4419_v35, %v2398_v36  ;;  %v2399_v62 = vadd.f32 %v2322_v17, %v1922_v0 }
 0x25a   : > { %v3145_v45 = vpop.f32.mrb[84].mxu0  ;;  %vm2469_vm7 = vcmp.ge.f32.partialorder %v2437_v10, 0.0  ;;  %v2501_v21 = vmul.f32 0.01, %v2437_v10  ;;  %v2438_v43 = vadd.f32 %v4419_v35, %v2399_v62  ;;  %v3077_v5 = vpop.f32.mrb[84].mxu1 }
 0x25b   : > { %v2333_v53 = vpop.f32.mrb[85].mxu0  ;;  %v1932_v30 = vpop.f32.mrb[85].mxu1 }
 0x25c   : > { %v3146_v47 = vpop.f32.mrb[86].mxu0  ;;  %v2533_v22 = vsel %vm2469_vm7, %v2437_v10, %v2501_v21  ;;  %vm2470_vm8 = vcmp.ge.f32.partialorder %v2438_v43, 0.0  ;;  %v2502_v16 = vmul.f32 0.01, %v2438_v43  ;;  %v1933_v20 = vadd.f32 %v1932_v30, %v4390_v32  ;;  %v3078_v8 = vpop.f32.mrb[86].mxu1 }
 0x25d   : > { %v2336_v38 = vpop.f32.mrb[87].mxu0  ;;  %2566 = vst.msk [vmem:[%s4427_s21 + $0xc0] sm:$0xff] %vm2541_vm14, %v2533_v22  ;;  %v1935_v15 = vpop.f32.mrb[87].mxu1 }
 0x25e   : > { %v2534_v40 = vsel %vm2470_vm8, %v2438_v43, %v2502_v16  ;;  %v2400_v51 = vadd.f32 %v2333_v53, %v1933_v20  ;;  %v1936_v11 = vadd.f32 %v1935_v15, %v4392_v49 }
 0x25f   : > { %2567 = vst.msk [vmem:[%s4427_s21 + $0xc8] sm:$0xff] %vm2541_vm14, %v2534_v40 }
 0x260   : > { %v2439_v12 = vadd.f32 %v4419_v35, %v2400_v51  ;;  %v2401_v63 = vadd.f32 %v2336_v38, %v1936_v11 }
 0x262   : > { %v3149_v54 = vpop.f32.mrb[88].mxu0  ;;  %vm2471_vm9 = vcmp.ge.f32.partialorder %v2439_v12, 0.0  ;;  %v2503_v56 = vmul.f32 0.01, %v2439_v12  ;;  %v2440_v32 = vadd.f32 %v4419_v35, %v2401_v63  ;;  %v3081_v2 = vpop.f32.mrb[88].mxu1 }
 0x263   : > { %v2347_v55 = vpop.f32.mrb[89].mxu0  ;;  %v1946_v27 = vpop.f32.mrb[89].mxu1 }
 0x264   : > { %v3150_v39 = vpop.f32.mrb[90].mxu0  ;;  %v2535_v61 = vsel %vm2471_vm9, %v2439_v12, %v2503_v56  ;;  %vm2472_vm10 = vcmp.ge.f32.partialorder %v2440_v32, 0.0  ;;  %v2504_v1 = vmul.f32 0.01, %v2440_v32  ;;  %v1947_v49 = vadd.f32 %v1946_v27, %v4398_v34  ;;  %v3082_v29 = vpop.f32.mrb[90].mxu1 }
 0x265   : > { %v2350_v28 = vpop.f32.mrb[91].mxu0  ;;  %2568 = vst.msk [vmem:[%s4427_s21 + $0xd0] sm:$0xff] %vm2541_vm14, %v2535_v61  ;;  %v1949_v3 = vpop.f32.mrb[91].mxu1 }
 0x266   : > { %v2536_v44 = vsel %vm2472_vm10, %v2440_v32, %v2504_v1  ;;  %v2402_v4 = vadd.f32 %v2347_v55, %v1947_v49  ;;  %v1950_v6 = vadd.f32 %v1949_v3, %v4400_v52 }
 0x267   : > { %2569 = vst.msk [vmem:[%s4427_s21 + $0xd8] sm:$0xff] %vm2541_vm14, %v2536_v44 }
 0x268   : > { %v2441_v9 = vadd.f32 %v4419_v35, %v2402_v4  ;;  %v2403_v25 = vadd.f32 %v2350_v28, %v1950_v6 }
 0x26a   : > { %v3153_v7 = vpop.f32.mrb[92].mxu0  ;;  %vm2473_vm11 = vcmp.ge.f32.partialorder %v2441_v9, 0.0  ;;  %v2505_v14 = vmul.f32 0.01, %v2441_v9  ;;  %v2442_v34 = vadd.f32 %v4419_v35, %v2403_v25  ;;  %v3085_v18 = vpop.f32.mrb[92].mxu1 }
 0x26b   : > { %v2361_v42 = vpop.f32.mrb[93].mxu0  ;;  %v1960_v50 = vpop.f32.mrb[93].mxu1 }
 0x26c   : > { %v3154_v46 = vpop.f32.mrb[94].mxu0  ;;  %v2537_v60 = vsel %vm2473_vm11, %v2441_v9, %v2505_v14  ;;  %vm2474_vm12 = vcmp.ge.f32.partialorder %v2442_v34, 0.0  ;;  %v2506_v52 = vmul.f32 0.01, %v2442_v34  ;;  %v1961_v48 = vadd.f32 %v1960_v50, %v4406_v57  ;;  %v3086_v58 = vpop.f32.mrb[94].mxu1 }
 0x26d   : > { %v2364_v59 = vpop.f32.mrb[95].mxu0  ;;  %2570 = vst.msk [vmem:[%s4427_s21 + $0xe0] sm:$0xff] %vm2541_vm14, %v2537_v60  ;;  %v1963_v26 = vpop.f32.mrb[95].mxu1 }
 0x26e   : > { %v2538_v24 = vsel %vm2474_vm12, %v2442_v34, %v2506_v52  ;;  %v2404_v33 = vadd.f32 %v2361_v42, %v1961_v48  ;;  %v1964_v19 = vadd.f32 %v1963_v26, %v4408_v13 }
 0x26f   : > { %2571 = vst.msk [vmem:[%s4427_s21 + $0xe8] sm:$0xff] %vm2541_vm14, %v2538_v24 }
 0x270   : > { %v2443_v37 = vadd.f32 %v4419_v35, %v2404_v33  ;;  %v2405_v23 = vadd.f32 %v2364_v59, %v1964_v19 }
 0x272   : > { %vm2475_vm13 = vcmp.ge.f32.partialorder %v2443_v37, 0.0  ;;  %v2507_v57 = vmul.f32 0.01, %v2443_v37  ;;  %v2444_v17 = vadd.f32 %v4419_v35, %v2405_v23 }
 0x274   : > { %v2539_v31 = vsel %vm2475_vm13, %v2443_v37, %v2507_v57  ;;  %vm2476_vm15 = vcmp.ge.f32.partialorder %v2444_v17, 0.0  ;;  %v2508_v41 = vmul.f32 0.01, %v2444_v17 }
 0x275   : > { %2572 = vst.msk [vmem:[%s4427_s21 + $0xf0] sm:$0xff] %vm2541_vm14, %v2539_v31 }
 0x276   : > { %v2540_v13 = vsel %vm2476_vm15, %v2444_v17, %v2508_v41 }
 0x277   : > { %2573 = vst.msk [vmem:[%s4427_s21 + $0xf8] sm:$0xff] %vm2541_vm14, %v2540_v13 }
 0x278   : > { %3280 = shalt.err (!%p3277_p5)
}
 0x279   : > { %s3281_s11 = scalar_lea.hbm %s4553_s30, 4096  ;;  %s3285_s13 = scalar_lea.hbm %s4614_s4, 8192 }
 0x27a   : > { %p3282_p6 = scmp.ne.s32.totalorder %s4553_s30, %s3281_s11  ;;  %p3286_p10 = scmp.lt.u32.totalorder %s4553_s30, %s4614_s4 }
 0x27b   : > { %p3287_p11 = scmp.lt.u32.totalorder %s3285_s13, %s3281_s11  ;;  %p3289_p13 = scmp.lt.u32.totalorder %s3281_s11, %s4553_s30 }
 0x27c   : > { %p3283_p7 = pnand %p3282_p6, %p3417_p4 }
 0x27d   : > { %p3288_p12 = por %p3287_p11, %p3286_p10 }
 0x27e   : > { %p3284_p9 = pneg %p3283_p7 }
 0x27f   : > { %p3290_p0 = por %p3289_p13, %p3288_p12 }
 0x281   : > { %p3291_p1 = pnand %p3290_p0, %p3284_p9 }
 0x283   : > { %3294 = shalt.err (!%p3291_p1)
}
 0x284   : > { %s3351_s22 = smov 128  }
 0x285   : > { %3165 = dma.vmem_to_hbm [thread:$0]  (%p3417_p4), %s4557_s24, 4096, %s4553_s30, %s4563_s18, %s3351_s22, %s3351_s22, %s3348_s9  }
 0x286 PF: > { %p3172_p2 = scmp.ge.s32.totalorder %s3345_s20, 2  ;;  %s2606_s26 = sand.u32 1, %s3325_s15  }
 0x287   : > { %s2607_s29 = scalar_lea.sflag [#allocation4], %s2606_s26 }
 0x288   : > { %p3168_p3 = pnand %p3172_p2, %p3424_p8 }
 0x28a   : > { %3320 = dma.done.wait (!%p3168_p3), %s2607_s29, 4096  }
 0x28b   : > { %3322 = vsyncadd (!%p3168_p3), %s2607_s29, 4294963200  ;;  %s17_s20 = sadd.s32 1, %s3345_s20   ;;  %s4621_s15 = smov %s3329_s16 }
 0x28c   : > { %p14_p5 = scmp.ge.s32.totalorder %s17_s20, 4   ;;  %s4622_s16 = smov %s3333_s17 }
 0x28d   : > { %s4623_s17 = smov %s3430_s28  ;;  %s4624_s18 = smov %s3341_s19 }
 0x28e   : > { %s4625_s19 = smov %s4627_s23  ;;  %16 = sbr.rel (!%p14_p5) target bundleno = 4 (0x4), region = 76 }
 0x295   :  { %2612 = vsyncpa [#allocation4], 1 }
 0x296   :  { %2614 = vsyncpa [#allocation4 + $0x1], 1 }

</bundles_post_ra>
